<compile_context>
chip_gen: v6e
topology: v6e:2x2x1
jax: 0.10.0
libtpu: 0.0.40
codegen_flags: <defaults>
</compile_context>

<pallas_src>
import numpy as np
import jax
import jax.numpy as jnp
from jax.experimental import pallas as pl
from jax.experimental.pallas import tpu as pltpu


def _round_up(x, m):
    return ((x + m - 1) // m) * m


def build_adjacency(contacts, L):
    """G[i, j] = number of contacts between positions i and j (symmetric)."""
    G = np.zeros((L, L), dtype=np.float32)
    for c1, c2 in contacts:
        G[int(c1), int(c2)] += 1.0
        G[int(c2), int(c1)] += 1.0
    # Contact multiplicities must stay exact after the bf16 cast used on the MXU.
    assert float(G.max()) <= 256.0, "contact multiplicity too large for exact bf16"
    return jnp.asarray(G)


def wdk_kernel(x1t_ref, r2_ref, g_ref, inv1_ref, inv2_ref, out_ref):
    """Computes one (TM, TN) tile of a^2 * K / sqrt(k1) / sqrt(k2).

    x1t_ref : (Lp, TM)     f32   X1^T tile (integer residue ids as floats)
    r2_ref  : (nS, Lp, TN) bf16  r2[s, l, n] = S[s, X2[n, l]]   (lane axis = n)
    g_ref   : (Lp, Lp)     bf16  contact-graph adjacency counts (zero padded)
    inv1_ref: (TM, 1)      f32   1 / sqrt(k1)
    inv2_ref: (1, TN)      f32   a^2 / sqrt(k2)
    out_ref : (TM, TN)     f32
    """
    Lp, TM = x1t_ref.shape
    nS, _, TN = r2_ref.shape

    # ---- hoisted once per tile (no per-row VMEM reloads) ----
    x1 = x1t_ref[...]                               # (Lp, TM) f32
    r2s = [r2_ref[s] for s in range(nS)]            # nS x (Lp, TN) bf16 slabs
    g = g_ref[...]                                  # (Lp, Lp) bf16
    zero = jnp.zeros((), jnp.bfloat16)

    # Rows per MXU batch: 8 always divides TM (TM is a multiple of 8) and keeps
    # the batched bf16/f32 temporaries small enough for v7x's 64 MiB VMEM while
    # amortizing MXU fill/drain over 8*128 = 1024 output columns.
    G_ROWS = 8

    for g0 in range(TM // G_ROWS):                  # static unroll: full scheduler visibility
        cols = []
        for mm in range(G_ROWS):
            m = g0 * G_ROWS + mm
            # Query residue ids for row m: cheap static lane slice of the
            # already-loaded tile (no masked where / cross-lane reduce).
            x1col = x1[:, m:m + 1]                  # (Lp, 1) f32
            # B_m[l, n] = S[X1[m, l], X2[n, l]]  -- nS-way one-hot VPU select.
            bm = jnp.where(x1col == 0.0, r2s[0], zero)
            for s in range(1, nS):
                bm = bm + jnp.where(x1col == float(s), r2s[s], zero)
            cols.append(bm)                         # (Lp, TN) bf16

        # Lane-concatenate the group -> ONE wide MXU matmul (f32 accumulation).
        bgrp = jnp.concatenate(cols, axis=1)        # (Lp, G_ROWS*TN) bf16
        cgrp = jnp.dot(g, bgrp, preferred_element_type=jnp.float32)
        # K rows for the group: sum over the contraction axis (sublane reduce).
        krow = jnp.sum(bgrp.astype(jnp.float32) * cgrp,
                       axis=0, keepdims=True)       # (1, G_ROWS*TN) f32

        for mm in range(G_ROWS):
            m = g0 * G_ROWS + mm
            out_ref[m:m + 1, :] = krow[:, mm * TN:(mm + 1) * TN]

    # ---- tile epilogue: single scaling pass  a^2 / sqrt(k1) / sqrt(k2) ----
    out_ref[...] = out_ref[...] * inv1_ref[...] * inv2_ref[...]


def fixed_wdk(S, X1, X2, contacts, a):
    """Pallas-backed forward of FixedWDK.

    S: (nS, nS) float; X1: (n1, L) int; X2: (n2, L) int; contacts: list of (i, j); a: scalar.
    Returns (n1, n2) float32.
    """
    S = jnp.asarray(S, jnp.float32)
    X1 = jnp.asarray(X1, jnp.int32)
    X2 = jnp.asarray(X2, jnp.int32)
    n1, L = X1.shape
    n2, _ = X2.shape
    nS = S.shape[0]

    G = build_adjacency(contacts, L)                               # (L, L) f32

    # ---- hoisted self-kernels k1 / k2 and scaling (computed once, not per tile) ----
    d1 = S[X1, X1]                                                 # (n1, L)
    d2 = S[X2, X2]                                                 # (n2, L)
    k1 = jnp.sum((d1 @ G) * d1, axis=1)                            # (n1,)
    k2 = jnp.sum((d2 @ G) * d2, axis=1)                            # (n2,)
    # NB: like the PyTorch module, a zero self-kernel yields inf/nan via rsqrt.
    inv1 = jax.lax.rsqrt(k1)[:, None]                              # (n1, 1)
    inv2 = (float(a) ** 2) * jax.lax.rsqrt(k2)[None, :]            # (1, n2)

    # ---- lane-dense operand prep ----
    r2 = jnp.transpose(S[:, X2], (0, 2, 1))                        # (nS, L, n2)
    x1t = X1.T.astype(jnp.float32)                                 # (L, n1)

    # ---- tile / padding choices ----
    # L padded to a multiple of 16 (bf16 sublane packing) -> unmasked matmul & reduce.
    Lp = _round_up(L, 16)
    TN = 128
    n2p = _round_up(n2, TN)
    TM = 128 if n1 > 128 else _round_up(max(n1, 1), 8)
    n1p = _round_up(n1, TM)

    x1t_p = jnp.zeros((Lp, n1p), jnp.float32).at[:L, :n1].set(x1t)
    r2_p = jnp.zeros((nS, Lp, n2p), jnp.bfloat16).at[:, :L, :n2].set(
        r2.astype(jnp.bfloat16))
    g_p = jnp.zeros((Lp, Lp), jnp.bfloat16).at[:L, :L].set(G.astype(jnp.bfloat16))
    inv1_p = jnp.zeros((n1p, 1), jnp.float32).at[:n1, :].set(inv1)
    inv2_p = jnp.zeros((1, n2p), jnp.float32).at[:, :n2].set(inv2)

    # Grid: n2-tiles on the OUTER (slow) axis so r2 -- the big streamed operand --
    # is DMA'd once per column tile and reused across the inner n1 sweep.
    grid = (n2p // TN, n1p // TM)
    out = pl.pallas_call(
        wdk_kernel,
        out_shape=jax.ShapeDtypeStruct((n1p, n2p), jnp.float32),
        grid=grid,
        in_specs=[
            pl.BlockSpec((Lp, TM), lambda j, i: (0, i)),            # X1^T tile (inner axis)
            pl.BlockSpec((nS, Lp, TN), lambda j, i: (0, 0, j)),     # r2 tile (outer axis, reused)
            pl.BlockSpec((Lp, Lp), lambda j, i: (0, 0)),            # G (fetched once)
            pl.BlockSpec((TM, 1), lambda j, i: (i, 0)),             # 1/sqrt(k1)
            pl.BlockSpec((1, TN), lambda j, i: (0, j)),             # a^2/sqrt(k2)
        ],
        out_specs=pl.BlockSpec((TM, TN), lambda j, i: (i, j)),
        compiler_params=pltpu.CompilerParams(
            dimension_semantics=("parallel", "parallel"),
            vmem_limit_bytes=32 * 1024 * 1024,
        ),
    )(x1t_p, r2_p, g_p, inv1_p, inv2_p)
    return out[:n1, :n2]


def reference_numpy(S, X1, X2, contacts, a):
    """Pure-numpy mirror of the PyTorch FixedWDK.forward (incl. -1 graph padding)."""
    S = np.asarray(S, dtype=np.float64)
    X1 = np.asarray(X1)
    X2 = np.asarray(X2)
    n1, L = X1.shape
    n2 = X2.shape[0]

    graph_list = [[] for _ in range(L)]
    for c1, c2 in contacts:
        graph_list[int(c1)].append(int(c2))
        graph_list[int(c2)].append(int(c1))
    max_deg = max(len(g) for g in graph_list)
    graph = np.array([g + [-1] * (max_deg - len(g)) for g in graph_list], dtype=np.int64)

    def wdk(subs):
        n = subs.shape[0]
        subs_p = np.concatenate([subs, np.zeros((n, 1), subs.dtype)], axis=1)
        return np.sum(subs_p[:, graph].sum(axis=2) * subs_p[:, :-1], axis=1)

    k1 = wdk(S[X1, X1]).reshape(n1, 1)
    k2 = wdk(S[X2, X2]).reshape(1, n2)
    L_inds = np.arange(L)
    subs = S[X1][:, L_inds, X2].reshape(n1 * n2, L)
    K = wdk(subs).reshape(n1, n2)
    K = K / np.sqrt(k1) / np.sqrt(k2)
    return (a ** 2) * K


def _make_case(key, n1, n2, L, n_S, d, n_extra_contacts):
    k_a, k_x1, k_x2, k_c = jax.random.split(key, 4)
    A = jax.random.normal(k_a, (n_S, d), dtype=jnp.float32)
    S = A @ A.T                                        # fixed PSD substitution matrix
    X1 = jax.random.randint(k_x1, (n1, L), 0, n_S, dtype=jnp.int32)
    X2 = jax.random.randint(k_x2, (n2, L), 0, n_S, dtype=jnp.int32)
    contacts = [(i, i + 1) for i in range(L - 1)] + [(0, L - 1)]
    extra = np.asarray(jax.random.randint(k_c, (n_extra_contacts, 2), 0, L, dtype=jnp.int32))
    contacts += [(int(c[0]), int(c[1])) for c in extra]
    return S, X1, X2, contacts


if __name__ == "__main__":
    a = 1.3
    key = jax.random.PRNGKey(0)
    k1, k2 = jax.random.split(key)

    # Case 1: small deterministic problem (single tile; n2 padded to a lane-dense 128).
    S, X1, X2, contacts = _make_case(k1, n1=8, n2=8, L=16, n_S=5, d=4, n_extra_contacts=3)
    out = jax.block_until_ready(fixed_wdk(S, X1, X2, contacts, a))
    ref = reference_numpy(np.asarray(S), np.asarray(X1), np.asarray(X2), contacts, a)
    assert out.shape == (8, 8)
    # bf16 MXU operands / bf16 S values (f32 accumulation) -> looser tolerance than all-f32.
    np.testing.assert_allclose(np.asarray(out), ref, rtol=2e-2, atol=1e-2)

    # Case 2: exercises the 2-D tiled grid, L padding to 32 and row/column padding.
    S, X1, X2, contacts = _make_case(k2, n1=150, n2=200, L=24, n_S=6, d=4, n_extra_contacts=5)
    out = jax.block_until_ready(fixed_wdk(S, X1, X2, contacts, a))
    ref = reference_numpy(np.asarray(S), np.asarray(X1), np.asarray(X2), contacts, a)
    assert out.shape == (150, 200)
    np.testing.assert_allclose(np.asarray(out), ref, rtol=2e-2, atol=1e-2)

    print("KERNEL_OK")
</pallas_src>

<mosaic_0001>
module attributes {stable_mosaic.version = 11 : i64} {
  func.func @wdk_kernel(%arg0: i32, %arg1: i32, %arg2: memref<16x8xf32, #tpu.memory_space<vmem>>, %arg3: memref<5x16x128xbf16, #tpu.memory_space<vmem>>, %arg4: memref<16x16xbf16, #tpu.memory_space<vmem>>, %arg5: memref<8x1xf32, #tpu.memory_space<vmem>>, %arg6: memref<1x128xf32, #tpu.memory_space<vmem>>, %arg7: memref<8x128xf32, #tpu.memory_space<vmem>>) attributes {dimension_semantics = [#tpu.dimension_semantics<parallel>, #tpu.dimension_semantics<parallel>], iteration_bounds = array<i64: 1, 1>, scalar_prefetch = 0 : i64, scratch_operands = 0 : i64, tpu.core_type = #tpu.core_type<tc>, window_params = [{transform_indices = @transform_0, window_bounds = array<i64: 16, 8>}, {transform_indices = @transform_1, window_bounds = array<i64: 5, 16, 128>}, {pipeline_mode = #tpu.pipeline_mode<synchronous>, transform_indices = @transform_2, window_bounds = array<i64: 16, 16>}, {transform_indices = @transform_3, window_bounds = array<i64: 8, 1>}, {transform_indices = @transform_4, window_bounds = array<i64: 1, 128>}, {transform_indices = @transform_5, window_bounds = array<i64: 8, 128>}]} {
    %c0 = arith.constant 0 : index
    %c0_0 = arith.constant 0 : index
    %0 = vector.load %arg2[%c0, %c0_0] : memref<16x8xf32, #tpu.memory_space<vmem>>, vector<16x8xf32>
    %c0_1 = arith.constant 0 : index
    %c0_2 = arith.constant 0 : index
    %c0_3 = arith.constant 0 : index
    %1 = vector.load %arg3[%c0_1, %c0_2, %c0_3] : memref<5x16x128xbf16, #tpu.memory_space<vmem>>, vector<1x16x128xbf16>
    %2 = vector.shape_cast %1 : vector<1x16x128xbf16> to vector<16x128xbf16>
    %c1 = arith.constant 1 : index
    %c0_4 = arith.constant 0 : index
    %c0_5 = arith.constant 0 : index
    %3 = vector.load %arg3[%c1, %c0_4, %c0_5] : memref<5x16x128xbf16, #tpu.memory_space<vmem>>, vector<1x16x128xbf16>
    %4 = vector.shape_cast %3 : vector<1x16x128xbf16> to vector<16x128xbf16>
    %c2 = arith.constant 2 : index
    %c0_6 = arith.constant 0 : index
    %c0_7 = arith.constant 0 : index
    %5 = vector.load %arg3[%c2, %c0_6, %c0_7] : memref<5x16x128xbf16, #tpu.memory_space<vmem>>, vector<1x16x128xbf16>
    %6 = vector.shape_cast %5 : vector<1x16x128xbf16> to vector<16x128xbf16>
    %c3 = arith.constant 3 : index
    %c0_8 = arith.constant 0 : index
    %c0_9 = arith.constant 0 : index
    %7 = vector.load %arg3[%c3, %c0_8, %c0_9] : memref<5x16x128xbf16, #tpu.memory_space<vmem>>, vector<1x16x128xbf16>
    %8 = vector.shape_cast %7 : vector<1x16x128xbf16> to vector<16x128xbf16>
    %c4 = arith.constant 4 : index
    %c0_10 = arith.constant 0 : index
    %c0_11 = arith.constant 0 : index
    %9 = vector.load %arg3[%c4, %c0_10, %c0_11] : memref<5x16x128xbf16, #tpu.memory_space<vmem>>, vector<1x16x128xbf16>
    %10 = vector.shape_cast %9 : vector<1x16x128xbf16> to vector<16x128xbf16>
    %c0_12 = arith.constant 0 : index
    %c0_13 = arith.constant 0 : index
    %11 = vector.load %arg4[%c0_12, %c0_13] : memref<16x16xbf16, #tpu.memory_space<vmem>>, vector<16x16xbf16>
    %12 = vector.extract_strided_slice %0 {offsets = [0, 0], sizes = [16, 1], strides = [1, 1]} : vector<16x8xf32> to vector<16x1xf32>
    %cst = arith.constant 0.000000e+00 : f32
    %13 = vector.broadcast %cst : f32 to vector<16x1xf32>
    %14 = arith.cmpf oeq, %12, %13 : vector<16x1xf32>
    %cst_14 = arith.constant 0.000000e+00 : bf16
    %15 = vector.shape_cast %14 : vector<16x1xi1> to vector<16x1xi1>
    %16 = vector.broadcast %15 : vector<16x1xi1> to vector<16x128xi1>
    %17 = vector.broadcast %cst_14 : bf16 to vector<16x128xbf16>
    %18 = arith.select %16, %2, %17 : vector<16x128xi1>, vector<16x128xbf16>
    %cst_15 = arith.constant 1.000000e+00 : f32
    %19 = vector.broadcast %cst_15 : f32 to vector<16x1xf32>
    %20 = arith.cmpf oeq, %12, %19 : vector<16x1xf32>
    %cst_16 = arith.constant 0.000000e+00 : bf16
    %21 = vector.shape_cast %20 : vector<16x1xi1> to vector<16x1xi1>
    %22 = vector.broadcast %21 : vector<16x1xi1> to vector<16x128xi1>
    %23 = vector.broadcast %cst_16 : bf16 to vector<16x128xbf16>
    %24 = arith.select %22, %4, %23 : vector<16x128xi1>, vector<16x128xbf16>
    %25 = arith.addf %18, %24 : vector<16x128xbf16>
    %cst_17 = arith.constant 2.000000e+00 : f32
    %26 = vector.broadcast %cst_17 : f32 to vector<16x1xf32>
    %27 = arith.cmpf oeq, %12, %26 : vector<16x1xf32>
    %cst_18 = arith.constant 0.000000e+00 : bf16
    %28 = vector.shape_cast %27 : vector<16x1xi1> to vector<16x1xi1>
    %29 = vector.broadcast %28 : vector<16x1xi1> to vector<16x128xi1>
    %30 = vector.broadcast %cst_18 : bf16 to vector<16x128xbf16>
    %31 = arith.select %29, %6, %30 : vector<16x128xi1>, vector<16x128xbf16>
    %32 = arith.addf %25, %31 : vector<16x128xbf16>
    %cst_19 = arith.constant 3.000000e+00 : f32
    %33 = vector.broadcast %cst_19 : f32 to vector<16x1xf32>
    %34 = arith.cmpf oeq, %12, %33 : vector<16x1xf32>
    %cst_20 = arith.constant 0.000000e+00 : bf16
    %35 = vector.shape_cast %34 : vector<16x1xi1> to vector<16x1xi1>
    %36 = vector.broadcast %35 : vector<16x1xi1> to vector<16x128xi1>
    %37 = vector.broadcast %cst_20 : bf16 to vector<16x128xbf16>
    %38 = arith.select %36, %8, %37 : vector<16x128xi1>, vector<16x128xbf16>
    %39 = arith.addf %32, %38 : vector<16x128xbf16>
    %cst_21 = arith.constant 4.000000e+00 : f32
    %40 = vector.broadcast %cst_21 : f32 to vector<16x1xf32>
    %41 = arith.cmpf oeq, %12, %40 : vector<16x1xf32>
    %cst_22 = arith.constant 0.000000e+00 : bf16
    %42 = vector.shape_cast %41 : vector<16x1xi1> to vector<16x1xi1>
    %43 = vector.broadcast %42 : vector<16x1xi1> to vector<16x128xi1>
    %44 = vector.broadcast %cst_22 : bf16 to vector<16x128xbf16>
    %45 = arith.select %43, %10, %44 : vector<16x128xi1>, vector<16x128xbf16>
    %46 = arith.addf %39, %45 : vector<16x128xbf16>
    %47 = vector.extract_strided_slice %0 {offsets = [0, 1], sizes = [16, 1], strides = [1, 1]} : vector<16x8xf32> to vector<16x1xf32>
    %cst_23 = arith.constant 0.000000e+00 : f32
    %48 = vector.broadcast %cst_23 : f32 to vector<16x1xf32>
    %49 = arith.cmpf oeq, %47, %48 : vector<16x1xf32>
    %cst_24 = arith.constant 0.000000e+00 : bf16
    %50 = vector.shape_cast %49 : vector<16x1xi1> to vector<16x1xi1>
    %51 = vector.broadcast %50 : vector<16x1xi1> to vector<16x128xi1>
    %52 = vector.broadcast %cst_24 : bf16 to vector<16x128xbf16>
    %53 = arith.select %51, %2, %52 : vector<16x128xi1>, vector<16x128xbf16>
    %cst_25 = arith.constant 1.000000e+00 : f32
    %54 = vector.broadcast %cst_25 : f32 to vector<16x1xf32>
    %55 = arith.cmpf oeq, %47, %54 : vector<16x1xf32>
    %cst_26 = arith.constant 0.000000e+00 : bf16
    %56 = vector.shape_cast %55 : vector<16x1xi1> to vector<16x1xi1>
    %57 = vector.broadcast %56 : vector<16x1xi1> to vector<16x128xi1>
    %58 = vector.broadcast %cst_26 : bf16 to vector<16x128xbf16>
    %59 = arith.select %57, %4, %58 : vector<16x128xi1>, vector<16x128xbf16>
    %60 = arith.addf %53, %59 : vector<16x128xbf16>
    %cst_27 = arith.constant 2.000000e+00 : f32
    %61 = vector.broadcast %cst_27 : f32 to vector<16x1xf32>
    %62 = arith.cmpf oeq, %47, %61 : vector<16x1xf32>
    %cst_28 = arith.constant 0.000000e+00 : bf16
    %63 = vector.shape_cast %62 : vector<16x1xi1> to vector<16x1xi1>
    %64 = vector.broadcast %63 : vector<16x1xi1> to vector<16x128xi1>
    %65 = vector.broadcast %cst_28 : bf16 to vector<16x128xbf16>
    %66 = arith.select %64, %6, %65 : vector<16x128xi1>, vector<16x128xbf16>
    %67 = arith.addf %60, %66 : vector<16x128xbf16>
    %cst_29 = arith.constant 3.000000e+00 : f32
    %68 = vector.broadcast %cst_29 : f32 to vector<16x1xf32>
    %69 = arith.cmpf oeq, %47, %68 : vector<16x1xf32>
    %cst_30 = arith.constant 0.000000e+00 : bf16
    %70 = vector.shape_cast %69 : vector<16x1xi1> to vector<16x1xi1>
    %71 = vector.broadcast %70 : vector<16x1xi1> to vector<16x128xi1>
    %72 = vector.broadcast %cst_30 : bf16 to vector<16x128xbf16>
    %73 = arith.select %71, %8, %72 : vector<16x128xi1>, vector<16x128xbf16>
    %74 = arith.addf %67, %73 : vector<16x128xbf16>
    %cst_31 = arith.constant 4.000000e+00 : f32
    %75 = vector.broadcast %cst_31 : f32 to vector<16x1xf32>
    %76 = arith.cmpf oeq, %47, %75 : vector<16x1xf32>
    %cst_32 = arith.constant 0.000000e+00 : bf16
    %77 = vector.shape_cast %76 : vector<16x1xi1> to vector<16x1xi1>
    %78 = vector.broadcast %77 : vector<16x1xi1> to vector<16x128xi1>
    %79 = vector.broadcast %cst_32 : bf16 to vector<16x128xbf16>
    %80 = arith.select %78, %10, %79 : vector<16x128xi1>, vector<16x128xbf16>
    %81 = arith.addf %74, %80 : vector<16x128xbf16>
    %82 = vector.extract_strided_slice %0 {offsets = [0, 2], sizes = [16, 1], strides = [1, 1]} : vector<16x8xf32> to vector<16x1xf32>
    %cst_33 = arith.constant 0.000000e+00 : f32
    %83 = vector.broadcast %cst_33 : f32 to vector<16x1xf32>
    %84 = arith.cmpf oeq, %82, %83 : vector<16x1xf32>
    %cst_34 = arith.constant 0.000000e+00 : bf16
    %85 = vector.shape_cast %84 : vector<16x1xi1> to vector<16x1xi1>
    %86 = vector.broadcast %85 : vector<16x1xi1> to vector<16x128xi1>
    %87 = vector.broadcast %cst_34 : bf16 to vector<16x128xbf16>
    %88 = arith.select %86, %2, %87 : vector<16x128xi1>, vector<16x128xbf16>
    %cst_35 = arith.constant 1.000000e+00 : f32
    %89 = vector.broadcast %cst_35 : f32 to vector<16x1xf32>
    %90 = arith.cmpf oeq, %82, %89 : vector<16x1xf32>
    %cst_36 = arith.constant 0.000000e+00 : bf16
    %91 = vector.shape_cast %90 : vector<16x1xi1> to vector<16x1xi1>
    %92 = vector.broadcast %91 : vector<16x1xi1> to vector<16x128xi1>
    %93 = vector.broadcast %cst_36 : bf16 to vector<16x128xbf16>
    %94 = arith.select %92, %4, %93 : vector<16x128xi1>, vector<16x128xbf16>
    %95 = arith.addf %88, %94 : vector<16x128xbf16>
    %cst_37 = arith.constant 2.000000e+00 : f32
    %96 = vector.broadcast %cst_37 : f32 to vector<16x1xf32>
    %97 = arith.cmpf oeq, %82, %96 : vector<16x1xf32>
    %cst_38 = arith.constant 0.000000e+00 : bf16
    %98 = vector.shape_cast %97 : vector<16x1xi1> to vector<16x1xi1>
    %99 = vector.broadcast %98 : vector<16x1xi1> to vector<16x128xi1>
    %100 = vector.broadcast %cst_38 : bf16 to vector<16x128xbf16>
    %101 = arith.select %99, %6, %100 : vector<16x128xi1>, vector<16x128xbf16>
    %102 = arith.addf %95, %101 : vector<16x128xbf16>
    %cst_39 = arith.constant 3.000000e+00 : f32
    %103 = vector.broadcast %cst_39 : f32 to vector<16x1xf32>
    %104 = arith.cmpf oeq, %82, %103 : vector<16x1xf32>
    %cst_40 = arith.constant 0.000000e+00 : bf16
    %105 = vector.shape_cast %104 : vector<16x1xi1> to vector<16x1xi1>
    %106 = vector.broadcast %105 : vector<16x1xi1> to vector<16x128xi1>
    %107 = vector.broadcast %cst_40 : bf16 to vector<16x128xbf16>
    %108 = arith.select %106, %8, %107 : vector<16x128xi1>, vector<16x128xbf16>
    %109 = arith.addf %102, %108 : vector<16x128xbf16>
    %cst_41 = arith.constant 4.000000e+00 : f32
    %110 = vector.broadcast %cst_41 : f32 to vector<16x1xf32>
    %111 = arith.cmpf oeq, %82, %110 : vector<16x1xf32>
    %cst_42 = arith.constant 0.000000e+00 : bf16
    %112 = vector.shape_cast %111 : vector<16x1xi1> to vector<16x1xi1>
    %113 = vector.broadcast %112 : vector<16x1xi1> to vector<16x128xi1>
    %114 = vector.broadcast %cst_42 : bf16 to vector<16x128xbf16>
    %115 = arith.select %113, %10, %114 : vector<16x128xi1>, vector<16x128xbf16>
    %116 = arith.addf %109, %115 : vector<16x128xbf16>
    %117 = vector.extract_strided_slice %0 {offsets = [0, 3], sizes = [16, 1], strides = [1, 1]} : vector<16x8xf32> to vector<16x1xf32>
    %cst_43 = arith.constant 0.000000e+00 : f32
    %118 = vector.broadcast %cst_43 : f32 to vector<16x1xf32>
    %119 = arith.cmpf oeq, %117, %118 : vector<16x1xf32>
    %cst_44 = arith.constant 0.000000e+00 : bf16
    %120 = vector.shape_cast %119 : vector<16x1xi1> to vector<16x1xi1>
    %121 = vector.broadcast %120 : vector<16x1xi1> to vector<16x128xi1>
    %122 = vector.broadcast %cst_44 : bf16 to vector<16x128xbf16>
    %123 = arith.select %121, %2, %122 : vector<16x128xi1>, vector<16x128xbf16>
    %cst_45 = arith.constant 1.000000e+00 : f32
    %124 = vector.broadcast %cst_45 : f32 to vector<16x1xf32>
    %125 = arith.cmpf oeq, %117, %124 : vector<16x1xf32>
    %cst_46 = arith.constant 0.000000e+00 : bf16
    %126 = vector.shape_cast %125 : vector<16x1xi1> to vector<16x1xi1>
    %127 = vector.broadcast %126 : vector<16x1xi1> to vector<16x128xi1>
    %128 = vector.broadcast %cst_46 : bf16 to vector<16x128xbf16>
    %129 = arith.select %127, %4, %128 : vector<16x128xi1>, vector<16x128xbf16>
    %130 = arith.addf %123, %129 : vector<16x128xbf16>
    %cst_47 = arith.constant 2.000000e+00 : f32
    %131 = vector.broadcast %cst_47 : f32 to vector<16x1xf32>
    %132 = arith.cmpf oeq, %117, %131 : vector<16x1xf32>
    %cst_48 = arith.constant 0.000000e+00 : bf16
    %133 = vector.shape_cast %132 : vector<16x1xi1> to vector<16x1xi1>
    %134 = vector.broadcast %133 : vector<16x1xi1> to vector<16x128xi1>
    %135 = vector.broadcast %cst_48 : bf16 to vector<16x128xbf16>
    %136 = arith.select %134, %6, %135 : vector<16x128xi1>, vector<16x128xbf16>
    %137 = arith.addf %130, %136 : vector<16x128xbf16>
    %cst_49 = arith.constant 3.000000e+00 : f32
    %138 = vector.broadcast %cst_49 : f32 to vector<16x1xf32>
    %139 = arith.cmpf oeq, %117, %138 : vector<16x1xf32>
    %cst_50 = arith.constant 0.000000e+00 : bf16
    %140 = vector.shape_cast %139 : vector<16x1xi1> to vector<16x1xi1>
    %141 = vector.broadcast %140 : vector<16x1xi1> to vector<16x128xi1>
    %142 = vector.broadcast %cst_50 : bf16 to vector<16x128xbf16>
    %143 = arith.select %141, %8, %142 : vector<16x128xi1>, vector<16x128xbf16>
    %144 = arith.addf %137, %143 : vector<16x128xbf16>
    %cst_51 = arith.constant 4.000000e+00 : f32
    %145 = vector.broadcast %cst_51 : f32 to vector<16x1xf32>
    %146 = arith.cmpf oeq, %117, %145 : vector<16x1xf32>
    %cst_52 = arith.constant 0.000000e+00 : bf16
    %147 = vector.shape_cast %146 : vector<16x1xi1> to vector<16x1xi1>
    %148 = vector.broadcast %147 : vector<16x1xi1> to vector<16x128xi1>
    %149 = vector.broadcast %cst_52 : bf16 to vector<16x128xbf16>
    %150 = arith.select %148, %10, %149 : vector<16x128xi1>, vector<16x128xbf16>
    %151 = arith.addf %144, %150 : vector<16x128xbf16>
    %152 = vector.extract_strided_slice %0 {offsets = [0, 4], sizes = [16, 1], strides = [1, 1]} : vector<16x8xf32> to vector<16x1xf32>
    %cst_53 = arith.constant 0.000000e+00 : f32
    %153 = vector.broadcast %cst_53 : f32 to vector<16x1xf32>
    %154 = arith.cmpf oeq, %152, %153 : vector<16x1xf32>
    %cst_54 = arith.constant 0.000000e+00 : bf16
    %155 = vector.shape_cast %154 : vector<16x1xi1> to vector<16x1xi1>
    %156 = vector.broadcast %155 : vector<16x1xi1> to vector<16x128xi1>
    %157 = vector.broadcast %cst_54 : bf16 to vector<16x128xbf16>
    %158 = arith.select %156, %2, %157 : vector<16x128xi1>, vector<16x128xbf16>
    %cst_55 = arith.constant 1.000000e+00 : f32
    %159 = vector.broadcast %cst_55 : f32 to vector<16x1xf32>
    %160 = arith.cmpf oeq, %152, %159 : vector<16x1xf32>
    %cst_56 = arith.constant 0.000000e+00 : bf16
    %161 = vector.shape_cast %160 : vector<16x1xi1> to vector<16x1xi1>
    %162 = vector.broadcast %161 : vector<16x1xi1> to vector<16x128xi1>
    %163 = vector.broadcast %cst_56 : bf16 to vector<16x128xbf16>
    %164 = arith.select %162, %4, %163 : vector<16x128xi1>, vector<16x128xbf16>
    %165 = arith.addf %158, %164 : vector<16x128xbf16>
    %cst_57 = arith.constant 2.000000e+00 : f32
    %166 = vector.broadcast %cst_57 : f32 to vector<16x1xf32>
    %167 = arith.cmpf oeq, %152, %166 : vector<16x1xf32>
    %cst_58 = arith.constant 0.000000e+00 : bf16
    %168 = vector.shape_cast %167 : vector<16x1xi1> to vector<16x1xi1>
    %169 = vector.broadcast %168 : vector<16x1xi1> to vector<16x128xi1>
    %170 = vector.broadcast %cst_58 : bf16 to vector<16x128xbf16>
    %171 = arith.select %169, %6, %170 : vector<16x128xi1>, vector<16x128xbf16>
    %172 = arith.addf %165, %171 : vector<16x128xbf16>
    %cst_59 = arith.constant 3.000000e+00 : f32
    %173 = vector.broadcast %cst_59 : f32 to vector<16x1xf32>
    %174 = arith.cmpf oeq, %152, %173 : vector<16x1xf32>
    %cst_60 = arith.constant 0.000000e+00 : bf16
    %175 = vector.shape_cast %174 : vector<16x1xi1> to vector<16x1xi1>
    %176 = vector.broadcast %175 : vector<16x1xi1> to vector<16x128xi1>
    %177 = vector.broadcast %cst_60 : bf16 to vector<16x128xbf16>
    %178 = arith.select %176, %8, %177 : vector<16x128xi1>, vector<16x128xbf16>
    %179 = arith.addf %172, %178 : vector<16x128xbf16>
    %cst_61 = arith.constant 4.000000e+00 : f32
    %180 = vector.broadcast %cst_61 : f32 to vector<16x1xf32>
    %181 = arith.cmpf oeq, %152, %180 : vector<16x1xf32>
    %cst_62 = arith.constant 0.000000e+00 : bf16
    %182 = vector.shape_cast %181 : vector<16x1xi1> to vector<16x1xi1>
    %183 = vector.broadcast %182 : vector<16x1xi1> to vector<16x128xi1>
    %184 = vector.broadcast %cst_62 : bf16 to vector<16x128xbf16>
    %185 = arith.select %183, %10, %184 : vector<16x128xi1>, vector<16x128xbf16>
    %186 = arith.addf %179, %185 : vector<16x128xbf16>
    %187 = vector.extract_strided_slice %0 {offsets = [0, 5], sizes = [16, 1], strides = [1, 1]} : vector<16x8xf32> to vector<16x1xf32>
    %cst_63 = arith.constant 0.000000e+00 : f32
    %188 = vector.broadcast %cst_63 : f32 to vector<16x1xf32>
    %189 = arith.cmpf oeq, %187, %188 : vector<16x1xf32>
    %cst_64 = arith.constant 0.000000e+00 : bf16
    %190 = vector.shape_cast %189 : vector<16x1xi1> to vector<16x1xi1>
    %191 = vector.broadcast %190 : vector<16x1xi1> to vector<16x128xi1>
    %192 = vector.broadcast %cst_64 : bf16 to vector<16x128xbf16>
    %193 = arith.select %191, %2, %192 : vector<16x128xi1>, vector<16x128xbf16>
    %cst_65 = arith.constant 1.000000e+00 : f32
    %194 = vector.broadcast %cst_65 : f32 to vector<16x1xf32>
    %195 = arith.cmpf oeq, %187, %194 : vector<16x1xf32>
    %cst_66 = arith.constant 0.000000e+00 : bf16
    %196 = vector.shape_cast %195 : vector<16x1xi1> to vector<16x1xi1>
    %197 = vector.broadcast %196 : vector<16x1xi1> to vector<16x128xi1>
    %198 = vector.broadcast %cst_66 : bf16 to vector<16x128xbf16>
    %199 = arith.select %197, %4, %198 : vector<16x128xi1>, vector<16x128xbf16>
    %200 = arith.addf %193, %199 : vector<16x128xbf16>
    %cst_67 = arith.constant 2.000000e+00 : f32
    %201 = vector.broadcast %cst_67 : f32 to vector<16x1xf32>
    %202 = arith.cmpf oeq, %187, %201 : vector<16x1xf32>
    %cst_68 = arith.constant 0.000000e+00 : bf16
    %203 = vector.shape_cast %202 : vector<16x1xi1> to vector<16x1xi1>
    %204 = vector.broadcast %203 : vector<16x1xi1> to vector<16x128xi1>
    %205 = vector.broadcast %cst_68 : bf16 to vector<16x128xbf16>
    %206 = arith.select %204, %6, %205 : vector<16x128xi1>, vector<16x128xbf16>
    %207 = arith.addf %200, %206 : vector<16x128xbf16>
    %cst_69 = arith.constant 3.000000e+00 : f32
    %208 = vector.broadcast %cst_69 : f32 to vector<16x1xf32>
    %209 = arith.cmpf oeq, %187, %208 : vector<16x1xf32>
    %cst_70 = arith.constant 0.000000e+00 : bf16
    %210 = vector.shape_cast %209 : vector<16x1xi1> to vector<16x1xi1>
    %211 = vector.broadcast %210 : vector<16x1xi1> to vector<16x128xi1>
    %212 = vector.broadcast %cst_70 : bf16 to vector<16x128xbf16>
    %213 = arith.select %211, %8, %212 : vector<16x128xi1>, vector<16x128xbf16>
    %214 = arith.addf %207, %213 : vector<16x128xbf16>
    %cst_71 = arith.constant 4.000000e+00 : f32
    %215 = vector.broadcast %cst_71 : f32 to vector<16x1xf32>
    %216 = arith.cmpf oeq, %187, %215 : vector<16x1xf32>
    %cst_72 = arith.constant 0.000000e+00 : bf16
    %217 = vector.shape_cast %216 : vector<16x1xi1> to vector<16x1xi1>
    %218 = vector.broadcast %217 : vector<16x1xi1> to vector<16x128xi1>
    %219 = vector.broadcast %cst_72 : bf16 to vector<16x128xbf16>
    %220 = arith.select %218, %10, %219 : vector<16x128xi1>, vector<16x128xbf16>
    %221 = arith.addf %214, %220 : vector<16x128xbf16>
    %222 = vector.extract_strided_slice %0 {offsets = [0, 6], sizes = [16, 1], strides = [1, 1]} : vector<16x8xf32> to vector<16x1xf32>
    %cst_73 = arith.constant 0.000000e+00 : f32
    %223 = vector.broadcast %cst_73 : f32 to vector<16x1xf32>
    %224 = arith.cmpf oeq, %222, %223 : vector<16x1xf32>
    %cst_74 = arith.constant 0.000000e+00 : bf16
    %225 = vector.shape_cast %224 : vector<16x1xi1> to vector<16x1xi1>
    %226 = vector.broadcast %225 : vector<16x1xi1> to vector<16x128xi1>
    %227 = vector.broadcast %cst_74 : bf16 to vector<16x128xbf16>
    %228 = arith.select %226, %2, %227 : vector<16x128xi1>, vector<16x128xbf16>
    %cst_75 = arith.constant 1.000000e+00 : f32
    %229 = vector.broadcast %cst_75 : f32 to vector<16x1xf32>
    %230 = arith.cmpf oeq, %222, %229 : vector<16x1xf32>
    %cst_76 = arith.constant 0.000000e+00 : bf16
    %231 = vector.shape_cast %230 : vector<16x1xi1> to vector<16x1xi1>
    %232 = vector.broadcast %231 : vector<16x1xi1> to vector<16x128xi1>
    %233 = vector.broadcast %cst_76 : bf16 to vector<16x128xbf16>
    %234 = arith.select %232, %4, %233 : vector<16x128xi1>, vector<16x128xbf16>
    %235 = arith.addf %228, %234 : vector<16x128xbf16>
    %cst_77 = arith.constant 2.000000e+00 : f32
    %236 = vector.broadcast %cst_77 : f32 to vector<16x1xf32>
    %237 = arith.cmpf oeq, %222, %236 : vector<16x1xf32>
    %cst_78 = arith.constant 0.000000e+00 : bf16
    %238 = vector.shape_cast %237 : vector<16x1xi1> to vector<16x1xi1>
    %239 = vector.broadcast %238 : vector<16x1xi1> to vector<16x128xi1>
    %240 = vector.broadcast %cst_78 : bf16 to vector<16x128xbf16>
    %241 = arith.select %239, %6, %240 : vector<16x128xi1>, vector<16x128xbf16>
    %242 = arith.addf %235, %241 : vector<16x128xbf16>
    %cst_79 = arith.constant 3.000000e+00 : f32
    %243 = vector.broadcast %cst_79 : f32 to vector<16x1xf32>
    %244 = arith.cmpf oeq, %222, %243 : vector<16x1xf32>
    %cst_80 = arith.constant 0.000000e+00 : bf16
    %245 = vector.shape_cast %244 : vector<16x1xi1> to vector<16x1xi1>
    %246 = vector.broadcast %245 : vector<16x1xi1> to vector<16x128xi1>
    %247 = vector.broadcast %cst_80 : bf16 to vector<16x128xbf16>
    %248 = arith.select %246, %8, %247 : vector<16x128xi1>, vector<16x128xbf16>
    %249 = arith.addf %242, %248 : vector<16x128xbf16>
    %cst_81 = arith.constant 4.000000e+00 : f32
    %250 = vector.broadcast %cst_81 : f32 to vector<16x1xf32>
    %251 = arith.cmpf oeq, %222, %250 : vector<16x1xf32>
    %cst_82 = arith.constant 0.000000e+00 : bf16
    %252 = vector.shape_cast %251 : vector<16x1xi1> to vector<16x1xi1>
    %253 = vector.broadcast %252 : vector<16x1xi1> to vector<16x128xi1>
    %254 = vector.broadcast %cst_82 : bf16 to vector<16x128xbf16>
    %255 = arith.select %253, %10, %254 : vector<16x128xi1>, vector<16x128xbf16>
    %256 = arith.addf %249, %255 : vector<16x128xbf16>
    %257 = vector.extract_strided_slice %0 {offsets = [0, 7], sizes = [16, 1], strides = [1, 1]} : vector<16x8xf32> to vector<16x1xf32>
    %cst_83 = arith.constant 0.000000e+00 : f32
    %258 = vector.broadcast %cst_83 : f32 to vector<16x1xf32>
    %259 = arith.cmpf oeq, %257, %258 : vector<16x1xf32>
    %cst_84 = arith.constant 0.000000e+00 : bf16
    %260 = vector.shape_cast %259 : vector<16x1xi1> to vector<16x1xi1>
    %261 = vector.broadcast %260 : vector<16x1xi1> to vector<16x128xi1>
    %262 = vector.broadcast %cst_84 : bf16 to vector<16x128xbf16>
    %263 = arith.select %261, %2, %262 : vector<16x128xi1>, vector<16x128xbf16>
    %cst_85 = arith.constant 1.000000e+00 : f32
    %264 = vector.broadcast %cst_85 : f32 to vector<16x1xf32>
    %265 = arith.cmpf oeq, %257, %264 : vector<16x1xf32>
    %cst_86 = arith.constant 0.000000e+00 : bf16
    %266 = vector.shape_cast %265 : vector<16x1xi1> to vector<16x1xi1>
    %267 = vector.broadcast %266 : vector<16x1xi1> to vector<16x128xi1>
    %268 = vector.broadcast %cst_86 : bf16 to vector<16x128xbf16>
    %269 = arith.select %267, %4, %268 : vector<16x128xi1>, vector<16x128xbf16>
    %270 = arith.addf %263, %269 : vector<16x128xbf16>
    %cst_87 = arith.constant 2.000000e+00 : f32
    %271 = vector.broadcast %cst_87 : f32 to vector<16x1xf32>
    %272 = arith.cmpf oeq, %257, %271 : vector<16x1xf32>
    %cst_88 = arith.constant 0.000000e+00 : bf16
    %273 = vector.shape_cast %272 : vector<16x1xi1> to vector<16x1xi1>
    %274 = vector.broadcast %273 : vector<16x1xi1> to vector<16x128xi1>
    %275 = vector.broadcast %cst_88 : bf16 to vector<16x128xbf16>
    %276 = arith.select %274, %6, %275 : vector<16x128xi1>, vector<16x128xbf16>
    %277 = arith.addf %270, %276 : vector<16x128xbf16>
    %cst_89 = arith.constant 3.000000e+00 : f32
    %278 = vector.broadcast %cst_89 : f32 to vector<16x1xf32>
    %279 = arith.cmpf oeq, %257, %278 : vector<16x1xf32>
    %cst_90 = arith.constant 0.000000e+00 : bf16
    %280 = vector.shape_cast %279 : vector<16x1xi1> to vector<16x1xi1>
    %281 = vector.broadcast %280 : vector<16x1xi1> to vector<16x128xi1>
    %282 = vector.broadcast %cst_90 : bf16 to vector<16x128xbf16>
    %283 = arith.select %281, %8, %282 : vector<16x128xi1>, vector<16x128xbf16>
    %284 = arith.addf %277, %283 : vector<16x128xbf16>
    %cst_91 = arith.constant 4.000000e+00 : f32
    %285 = vector.broadcast %cst_91 : f32 to vector<16x1xf32>
    %286 = arith.cmpf oeq, %257, %285 : vector<16x1xf32>
    %cst_92 = arith.constant 0.000000e+00 : bf16
    %287 = vector.shape_cast %286 : vector<16x1xi1> to vector<16x1xi1>
    %288 = vector.broadcast %287 : vector<16x1xi1> to vector<16x128xi1>
    %289 = vector.broadcast %cst_92 : bf16 to vector<16x128xbf16>
    %290 = arith.select %288, %10, %289 : vector<16x128xi1>, vector<16x128xbf16>
    %291 = arith.addf %284, %290 : vector<16x128xbf16>
    %292 = tpu.concatenate %46, %81, %116, %151, %186, %221, %256, %291 in 1 : vector<16x128xbf16>, vector<16x128xbf16>, vector<16x128xbf16>, vector<16x128xbf16>, vector<16x128xbf16>, vector<16x128xbf16>, vector<16x128xbf16>, vector<16x128xbf16> -> vector<16x1024xbf16>
    %cst_93 = arith.constant dense<0.000000e+00> : vector<16x1024xf32>
    %293 = tpu.matmul %11, %292, %cst_93 {dimension_numbers = #tpu.dot_dimension_numbers<[1], [0], [0], [1], [0, 0, 1, 1], [], []>} : vector<16x16xbf16>, vector<16x1024xbf16>, vector<16x1024xf32> -> vector<16x1024xf32>
    %294 = arith.extf %292 : vector<16x1024xbf16> to vector<16x1024xf32>
    %295 = arith.mulf %294, %293 : vector<16x1024xf32>
    %cst_94 = arith.constant dense<0.000000e+00> : vector<1024xf32>
    %296 = vector.multi_reduction <add>, %295, %cst_94 [0] : vector<16x1024xf32> to vector<1024xf32>
    %297 = vector.shape_cast %296 : vector<1024xf32> to vector<1x1024xf32>
    %298 = vector.extract_strided_slice %297 {offsets = [0, 0], sizes = [1, 128], strides = [1, 1]} : vector<1x1024xf32> to vector<1x128xf32>
    %c0_95 = arith.constant 0 : index
    %c0_96 = arith.constant 0 : index
    %299 = vector.load %arg7[%c0_95, %c0_96] : memref<8x128xf32, #tpu.memory_space<vmem>>, vector<1x128xf32>
    tpu.vector_store %arg7[%c0_95, %c0_96], %298 {strides = array<i32>} : memref<8x128xf32, #tpu.memory_space<vmem>>, vector<1x128xf32>,
    %300 = vector.extract_strided_slice %297 {offsets = [0, 128], sizes = [1, 128], strides = [1, 1]} : vector<1x1024xf32> to vector<1x128xf32>
    %c1_97 = arith.constant 1 : index
    %c0_98 = arith.constant 0 : index
    %301 = vector.load %arg7[%c1_97, %c0_98] : memref<8x128xf32, #tpu.memory_space<vmem>>, vector<1x128xf32>
    tpu.vector_store %arg7[%c1_97, %c0_98], %300 {strides = array<i32>} : memref<8x128xf32, #tpu.memory_space<vmem>>, vector<1x128xf32>,
    %302 = vector.extract_strided_slice %297 {offsets = [0, 256], sizes = [1, 128], strides = [1, 1]} : vector<1x1024xf32> to vector<1x128xf32>
    %c2_99 = arith.constant 2 : index
    %c0_100 = arith.constant 0 : index
    %303 = vector.load %arg7[%c2_99, %c0_100] : memref<8x128xf32, #tpu.memory_space<vmem>>, vector<1x128xf32>
    tpu.vector_store %arg7[%c2_99, %c0_100], %302 {strides = array<i32>} : memref<8x128xf32, #tpu.memory_space<vmem>>, vector<1x128xf32>,
    %304 = vector.extract_strided_slice %297 {offsets = [0, 384], sizes = [1, 128], strides = [1, 1]} : vector<1x1024xf32> to vector<1x128xf32>
    %c3_101 = arith.constant 3 : index
    %c0_102 = arith.constant 0 : index
    %305 = vector.load %arg7[%c3_101, %c0_102] : memref<8x128xf32, #tpu.memory_space<vmem>>, vector<1x128xf32>
    tpu.vector_store %arg7[%c3_101, %c0_102], %304 {strides = array<i32>} : memref<8x128xf32, #tpu.memory_space<vmem>>, vector<1x128xf32>,
    %306 = vector.extract_strided_slice %297 {offsets = [0, 512], sizes = [1, 128], strides = [1, 1]} : vector<1x1024xf32> to vector<1x128xf32>
    %c4_103 = arith.constant 4 : index
    %c0_104 = arith.constant 0 : index
    %307 = vector.load %arg7[%c4_103, %c0_104] : memref<8x128xf32, #tpu.memory_space<vmem>>, vector<1x128xf32>
    tpu.vector_store %arg7[%c4_103, %c0_104], %306 {strides = array<i32>} : memref<8x128xf32, #tpu.memory_space<vmem>>, vector<1x128xf32>,
    %308 = vector.extract_strided_slice %297 {offsets = [0, 640], sizes = [1, 128], strides = [1, 1]} : vector<1x1024xf32> to vector<1x128xf32>
    %c5 = arith.constant 5 : index
    %c0_105 = arith.constant 0 : index
    %309 = vector.load %arg7[%c5, %c0_105] : memref<8x128xf32, #tpu.memory_space<vmem>>, vector<1x128xf32>
    tpu.vector_store %arg7[%c5, %c0_105], %308 {strides = array<i32>} : memref<8x128xf32, #tpu.memory_space<vmem>>, vector<1x128xf32>,
    %310 = vector.extract_strided_slice %297 {offsets = [0, 768], sizes = [1, 128], strides = [1, 1]} : vector<1x1024xf32> to vector<1x128xf32>
    %c6 = arith.constant 6 : index
    %c0_106 = arith.constant 0 : index
    %311 = vector.load %arg7[%c6, %c0_106] : memref<8x128xf32, #tpu.memory_space<vmem>>, vector<1x128xf32>
    tpu.vector_store %arg7[%c6, %c0_106], %310 {strides = array<i32>} : memref<8x128xf32, #tpu.memory_space<vmem>>, vector<1x128xf32>,
    %312 = vector.extract_strided_slice %297 {offsets = [0, 896], sizes = [1, 128], strides = [1, 1]} : vector<1x1024xf32> to vector<1x128xf32>
    %c7 = arith.constant 7 : index
    %c0_107 = arith.constant 0 : index
    %313 = vector.load %arg7[%c7, %c0_107] : memref<8x128xf32, #tpu.memory_space<vmem>>, vector<1x128xf32>
    tpu.vector_store %arg7[%c7, %c0_107], %312 {strides = array<i32>} : memref<8x128xf32, #tpu.memory_space<vmem>>, vector<1x128xf32>,
    %c0_108 = arith.constant 0 : index
    %c0_109 = arith.constant 0 : index
    %314 = vector.load %arg7[%c0_108, %c0_109] : memref<8x128xf32, #tpu.memory_space<vmem>>, vector<8x128xf32>
    %c0_110 = arith.constant 0 : index
    %c0_111 = arith.constant 0 : index
    %315 = vector.load %arg5[%c0_110, %c0_111] : memref<8x1xf32, #tpu.memory_space<vmem>>, vector<8x1xf32>
    %316 = vector.broadcast %315 : vector<8x1xf32> to vector<8x128xf32>
    %317 = arith.mulf %314, %316 : vector<8x128xf32>
    %c0_112 = arith.constant 0 : index
    %c0_113 = arith.constant 0 : index
    %318 = vector.load %arg6[%c0_112, %c0_113] : memref<1x128xf32, #tpu.memory_space<vmem>>, vector<1x128xf32>
    %319 = vector.broadcast %318 : vector<1x128xf32> to vector<8x128xf32>
    %320 = arith.mulf %317, %319 : vector<8x128xf32>
    %c0_114 = arith.constant 0 : index
    %c0_115 = arith.constant 0 : index
    %321 = vector.load %arg7[%c0_114, %c0_115] : memref<8x128xf32, #tpu.memory_space<vmem>>, vector<8x128xf32>
    tpu.vector_store %arg7[%c0_114, %c0_115], %320 {strides = array<i32>} : memref<8x128xf32, #tpu.memory_space<vmem>>, vector<8x128xf32>,
    return
  }
  func.func @transform_0(%arg0: i32, %arg1: i32) -> (i32, i32) {
    %c0_i32 = arith.constant 0 : i32
    %c0_i32_0 = arith.constant 0 : i32
    return %c0_i32, %arg1 : i32, i32
  }
  func.func @transform_1(%arg0: i32, %arg1: i32) -> (i32, i32, i32) {
    %c0_i32 = arith.constant 0 : i32
    %c0_i32_0 = arith.constant 0 : i32
    %c0_i32_1 = arith.constant 0 : i32
    return %c0_i32, %c0_i32_0, %arg0 : i32, i32, i32
  }
  func.func @transform_2(%arg0: i32, %arg1: i32) -> (i32, i32) {
    %c0_i32 = arith.constant 0 : i32
    %c0_i32_0 = arith.constant 0 : i32
    %c0_i32_1 = arith.constant 0 : i32
    return %c0_i32, %c0_i32_0 : i32, i32
  }
  func.func @transform_3(%arg0: i32, %arg1: i32) -> (i32, i32) {
    %c0_i32 = arith.constant 0 : i32
    %c0_i32_0 = arith.constant 0 : i32
    return %arg1, %c0_i32 : i32, i32
  }
  func.func @transform_4(%arg0: i32, %arg1: i32) -> (i32, i32) {
    %c0_i32 = arith.constant 0 : i32
    %c0_i32_0 = arith.constant 0 : i32
    return %c0_i32, %arg0 : i32, i32
  }
  func.func @transform_5(%arg0: i32, %arg1: i32) -> (i32, i32) {
    %c0_i32 = arith.constant 0 : i32
    return %arg1, %arg0 : i32, i32
  }
}

</mosaic_0001>

<bundles_post_ra>
// kernel: tpu_custom_call.1
= control target key start
LH: loop header
LB: loop body
LE: loop exit
PB: predicated region body
PF: predicated region fallthrough
CT: control target
= control target key end

     0   :  { %10 = vsyncpa [#allocation3], 0  ;;  %s1966_s0 = inlined_call_operand.vmem [shape: f32[16,8], index: 0, kind: input, shape index: {}]   ;;  %s1967_s1 = inlined_call_operand.hbm [shape: bf16[5,16,128], index: 1, kind: input, shape index: {}]   ;;  %s1968_s2 = inlined_call_operand.vmem [shape: bf16[16,16], index: 2, kind: input, shape index: {}]   ;;  %s1969_s3 = inlined_call_operand.vmem [shape: f32[8,1], index: 3, kind: input, shape index: {}]   ;;  %s1970_s4 = inlined_call_operand.vmem [shape: f32[1,128], index: 4, kind: input, shape index: {}]   ;;  %s1971_s5 = inlined_call_operand.hbm [shape: f32[8,128], index: 5, kind: output, shape index: {}]  }
   0x1   :  { %11 = vsyncpa [#allocation4], 0  ;;  %s1087_s18 = smov [#allocation2]  }
   0x2   :  { %s19_s19 = sshll.u32 %s1087_s18, 4  ;;  %s20_s19 = int_to_ptr.vmem [resolvable:$true] %s19_s19 }
   0x3   :  { %s1051_s20 = scalar_lea.vmem %s20_s19, 640  ;;  %p1056_p1 = scmp.lt.s32.totalorder %s20_s19, %s20_s19 }
   0x4   :  { %p1052_p0 = scmp.ne.s32.totalorder %s20_s19, %s1051_s20  ;;  %p1057_p2 = scmp.lt.s32.totalorder %s1051_s20, %s1051_s20 }
   0x6   :  { %p1058_p3 = por %p1057_p2, %p1056_p1 }
   0x8   :  { %p1059_p4 = pnand %p1058_p3, %p1052_p0 }
   0xa   :  { %1062 = shalt.err (!%p1059_p4)
}
   0xb   :  { %s1088_s21 = smov 64   ;;  %s1089_s22 = smov 4  }
   0xc   :  { %25 = dma.hbm_to_vmem [thread:$0]  %s1967_s1, 640, %s20_s19, [#allocation3], %s1088_s21, %s1088_s21, %s1089_s22  }
   0xd   :  { %1083 = dma.done.wait [#allocation3], 640  }
   0xe   :  { %1084 = vsyncadd [#allocation3], 4294966656  ;;  %v1090_v0 = vmov 1   ;;  %v1091_v1 = vmov 0   ;;  %v36_v2 = vld [vmem:[%s1966_s0] sm:$0xff]  ;;  %v37_v3 = vld [vmem:[%s1966_s0 + $0x8] sm:$0xff] }
   0xf   :  { %1002 = vset.pattern.permute.xlu0 %v1090_v0  ;;  %1001 = vset.pattern.permute.xlu1 %v1090_v0  ;;  %vm70_vm0 = vcmp.eq.f32.partialorder %v36_v2, 1.0  ;;  %vm54_vm1 = vcmp.eq.f32.partialorder %v36_v2, 0.0  ;;  %vm88_vm2 = vcmp.eq.f32.partialorder %v36_v2, 2.0  ;;  %vm55_vm3 = vcmp.eq.f32.partialorder %v37_v3, 0.0  ;;  %v1263_v25 = vld [vmem:[#allocation2 + $0x8] sm:$0xf] }
  0x10   :  { %707 = vmatprep.mubr.bf16.mxu0 %v1091_v1  ;;  %750 = vmatprep.mubr.bf16.mxu1 %v1091_v1  ;;  %v1143_v4 = vsel %vm70_vm0, 1, %v1091_v1  ;;  %v1146_v5 = vsel %vm54_vm1, 1, %v1091_v1  ;;  %v1151_v6 = vsel %vm88_vm2, 1, %v1091_v1  ;;  %v1154_v7 = vsel %vm55_vm3, 1, %v1091_v1  ;;  %v1265_v26 = vld [vmem:[#allocation2] sm:$0xf] }
  0x11   :  { %155 = vperm.xlu0 %1002, %v1143_v4   ;;  %143 = vperm.xlu1 %1001, %v1146_v5   ;;  %vm107_vm4 = vcmp.eq.f32.partialorder %v37_v3, 3.0  ;;  %vm71_vm5 = vcmp.eq.f32.partialorder %v37_v3, 1.0  ;;  %v1092_v10 = vmov 2   ;;  %v1093_v11 = vmov 3   ;;  %v1462_v56 = vld [vmem:[#allocation2 + $0x20] sm:$0xf] }
  0x12   :  { %v1159_v8 = vsel %vm107_vm4, 1, %v1091_v1  ;;  %v1162_v9 = vsel %vm71_vm5, 1, %v1091_v1  ;;  %vm89_vm6 = vcmp.eq.f32.partialorder %v37_v3, 2.0  ;;  %vm124_vm7 = vcmp.eq.f32.partialorder %v36_v2, 4.0  ;;  %s1098_s6 = smov [#allocation5]  }
  0x13   :  { %v1179_v12 = vsel %vm89_vm6, 1, %v1091_v1  ;;  %v1185_v13 = vsel %vm124_vm7, 1, %v1091_v1  ;;  %vm106_vm8 = vcmp.eq.f32.partialorder %v36_v2, 3.0  ;;  %vm125_vm9 = vcmp.eq.f32.partialorder %v37_v3, 4.0  ;;  %s966_s7 = sshll.u32 %s1098_s6, 4  ;;  %s967_s7 = int_to_ptr.vmem [resolvable:$true] %s966_s7 }
  0x14   :  { %v1198_v14 = vsel %vm106_vm8, 1, %v1091_v1  ;;  %v1203_v15 = vsel %vm125_vm9, 1, %v1091_v1  ;;  %v1094_v16 = vmov 5   ;;  %v1095_v17 = vmov 6   ;;  %s1063_s8 = scalar_lea.vmem %s967_s7, 128  ;;  %p1068_p6 = scmp.lt.s32.totalorder %s967_s7, %s967_s7 }
  0x15   :  { %169 = vperm.xlu0 %1002, %v1151_v6   ;;  %146 = vperm.xlu1 %1001, %v1154_v7   ;;  %v1096_v18 = vmov 7   ;;  %v1097_v19 = vmov 4   ;;  %v1983_v63 = vmov 0  ;;  %p1064_p5 = scmp.ne.s32.totalorder %s967_s7, %s1063_s8  ;;  %p1069_p7 = scmp.lt.s32.totalorder %s1063_s8, %s1063_s8 }
  0x17   :  { %p1070_p8 = por %p1069_p7, %p1068_p6 }
  0x19   :  { %186 = vperm.xlu0 %1002, %v1159_v8   ;;  %158 = vperm.xlu1 %1001, %v1162_v9   ;;  %p1071_p9 = pnand %p1070_p8, %p1064_p5 }
  0x1d   :  { %1011 = vset.pattern.permute.xlu0 %v1092_v10  ;;  %1003 = vset.pattern.permute.xlu1 %v1093_v11 }
  0x1e   :  { %214 = vperm.xlu0 %1011, %v1154_v7   ;;  %279 = vperm.xlu1 %1003, %v1146_v5  }
  0x22   :  { %237 = vperm.xlu0 %1011, %v1151_v6   ;;  %291 = vperm.xlu1 %1003, %v1143_v4  }
  0x26   :  { %254 = vperm.xlu0 %1011, %v1159_v8   ;;  %294 = vperm.xlu1 %1003, %v1162_v9  }
  0x2a   :  { %1015 = vset.pattern.permute.xlu0 %v1093_v11  ;;  %1004 = vset.pattern.permute.xlu1 %v1091_v1 }
  0x2b   :  { %282 = vperm.xlu0 %1015, %v1154_v7   ;;  %78 = vperm.xlu1 %1004, %v1162_v9  }
  0x2f   :  { %308 = vperm.xlu0 %1015, %v1179_v12   ;;  %1005 = vset.pattern.permute.xlu1 %v1092_v10 }
  0x30   :  { %211 = vperm.xlu1 %1005, %v1146_v5  }
  0x33   :  { %333 = vperm.xlu0 %1015, %v1185_v13  }
  0x34   :  { %223 = vperm.xlu1 %1005, %v1143_v4  }
  0x37   :  { %1017 = vset.pattern.permute.xlu0 %v1091_v1 }
  0x38   :  { %59 = vperm.xlu0 %1017, %v1146_v5   ;;  %226 = vperm.xlu1 %1005, %v1162_v9  }
  0x3c   :  { %62 = vperm.xlu0 %1017, %v1154_v7   ;;  %1006 = vset.pattern.permute.xlu1 %v1090_v0 }
  0x3d   :  { %172 = vperm.xlu1 %1006, %v1179_v12  }
  0x40   :  { %75 = vperm.xlu0 %1017, %v1143_v4  }
  0x41   :  { %1007 = vset.pattern.permute.xlu1 %v1093_v11 }
  0x42   :  { %305 = vperm.xlu1 %1007, %v1151_v6  }
  0x44   :  { %111 = vperm.xlu0 %1017, %v1198_v14  }
  0x46   :  { %1008 = vset.pattern.permute.xlu1 %v1091_v1 }
  0x47   :  { %93 = vperm.xlu1 %1008, %v1151_v6  }
  0x48   :  { %132 = vperm.xlu0 %1017, %v1203_v15  }
  0x4b   :  { %96 = vperm.xlu1 %1008, %v1179_v12  }
  0x4c   :  { %1021 = vset.pattern.permute.xlu0 %v1094_v16 }
  0x4d   :  { %415 = vperm.xlu0 %1021, %v1146_v5  }
  0x4f   :  { %1009 = vset.pattern.permute.xlu1 %v1092_v10 }
  0x50   :  { %240 = vperm.xlu1 %1009, %v1179_v12  }
  0x51   :  { %430 = vperm.xlu0 %1021, %v1162_v9  }
  0x54   :  { %1010 = vset.pattern.permute.xlu1 %v1090_v0 }
  0x55   :  { %183 = vperm.xlu1 %1010, %v1198_v14   ;;  %441 = vperm.xlu0 %1021, %v1151_v6  }
  0x59   :  { %1012 = vset.pattern.permute.xlu1 %v1093_v11  ;;  %458 = vperm.xlu0 %1021, %v1159_v8  }
  0x5a   :  { %319 = vperm.xlu1 %1012, %v1198_v14  }
  0x5d   :  { %1031 = vset.pattern.permute.xlu0 %v1095_v17 }
  0x5e   :  { %322 = vperm.xlu1 %1012, %v1159_v8   ;;  %486 = vperm.xlu0 %1031, %v1154_v7  }
  0x62   :  { %1013 = vset.pattern.permute.xlu1 %v1091_v1  ;;  %509 = vperm.xlu0 %1031, %v1151_v6  }
  0x63   :  { %114 = vperm.xlu1 %1013, %v1159_v8  }
  0x66   :  { %526 = vperm.xlu0 %1031, %v1159_v8  }
  0x67   :  { %1014 = vset.pattern.permute.xlu1 %v1092_v10 }
  0x68   :  { %251 = vperm.xlu1 %1014, %v1198_v14  }
  0x6a   :  { %1035 = vset.pattern.permute.xlu0 %v1096_v18 }
  0x6b   :  { %554 = vperm.xlu0 %1035, %v1154_v7  }
  0x6c   :  { %1016 = vset.pattern.permute.xlu1 %v1090_v0  ;;  %v1985_v0 = vmov 0 }
  0x6d   :  { %197 = vperm.xlu1 %1016, %v1185_v13  }
  0x6f   :  { %580 = vperm.xlu0 %1035, %v1179_v12  }
  0x71   :  { %200 = vperm.xlu1 %1016, %v1203_v15  }
  0x73   :  { %605 = vperm.xlu0 %1035, %v1185_v13  }
  0x75   :  { %1018 = vset.pattern.permute.xlu1 %v1093_v11 }
  0x76   :  { %336 = vperm.xlu1 %1018, %v1203_v15  }
  0x77   :  { %1037 = vset.pattern.permute.xlu0 %v1097_v19 }
  0x78   :  { %347 = vperm.xlu0 %1037, %v1146_v5  }
  0x7a   :  { %1019 = vset.pattern.permute.xlu1 %v1091_v1 }
  0x7b   :  { %129 = vperm.xlu1 %1019, %v1185_v13  }
  0x7c   :  { %362 = vperm.xlu0 %1037, %v1162_v9  }
  0x7f   :  { %1020 = vset.pattern.permute.xlu1 %v1092_v10  ;;  %v1384_v10 = vld [vmem:[#allocation2 + $0x4] sm:$0xf] }
  0x80   :  { %265 = vperm.xlu1 %1020, %v1185_v13   ;;  %387 = vperm.xlu0 %1037, %v1198_v14  }
  0x84   :  { %268 = vperm.xlu1 %1020, %v1203_v15   ;;  %404 = vperm.xlu0 %1037, %v1203_v15  }
  0x88   :  { %1022 = vset.pattern.permute.xlu1 %v1094_v16  ;;  %1041 = vset.pattern.permute.xlu0 %v1091_v1 }
  0x89   :  { %418 = vperm.xlu1 %1022, %v1154_v7  }
  0x8c   :  { %v1251_v20 = vpop.permute.xlu1 %143  ;;  %v156_v31 = vpop.permute.xlu0 %155 }
  0x8d   :  { %427 = vperm.xlu1 %1022, %v1143_v4   ;;  %vm160_vm2 = vcmp.eq.s32.totalorder %v156_v31, 1  ;;  %vm148_vm3 = vcmp.eq.s32.totalorder %v1251_v20, 1  ;;  %v1398_v20 = vld [vmem:[#allocation2 + $0x10] sm:$0xf] }
  0x8e   :  { %vm1324_vm6 = vmpackc.low %vm160_vm2, %vm160_vm2 }
  0x8f   :  { %vm1330_vm8 = vmpackc.low %vm148_vm3, %vm148_vm3 }
  0x90   :  { %v1254_v21 = vpop.permute.xlu1 %146  ;;  %v170_v33 = vpop.permute.xlu0 %169 }
  0x91   :  { %1023 = vset.pattern.permute.xlu1 %v1096_v18  ;;  %vm174_vm4 = vcmp.eq.s32.totalorder %v170_v33, 1  ;;  %vm149_vm5 = vcmp.eq.s32.totalorder %v1254_v21, 1 }
  0x92   :  { %551 = vperm.xlu1 %1023, %v1146_v5  }
  0x94   :  { %v1258_v22 = vpop.permute.xlu1 %158  ;;  %v187_v35 = vpop.permute.xlu0 %186 }
  0x95   :  { %vm161_vm7 = vcmp.eq.s32.totalorder %v1258_v22, 1 }
  0x96   :  { %563 = vperm.xlu1 %1023, %v1143_v4  }
  0x99   :  { %v280_v23 = vpop.permute.xlu1 %279  ;;  %v1281_v37 = vpop.permute.xlu0 %214 }
  0x9a   :  { %vm284_vm10 = vcmp.eq.s32.totalorder %v280_v23, 1  ;;  %566 = vperm.xlu1 %1023, %v1162_v9  }
  0x9b   :  { %vm286_vm11 = vmpackc.low %vm284_vm10, %vm284_vm10 }
  0x9c   :  { %v288_v27 = vsel %vm286_vm11, %v1265_v26, 0  ;;  %vm1335_vm10 = vmpackc.low %vm174_vm4, %vm174_vm4 }
  0x9d   :  { %v292_v24 = vpop.permute.xlu1 %291  ;;  %v1291_v42 = vpop.permute.xlu0 %237  ;;  %vm1339_vm11 = vmpackc.low %vm149_vm5, %vm149_vm5 }
  0x9e   :  { %vm296_vm12 = vcmp.eq.s32.totalorder %v292_v24, 1  ;;  %1024 = vset.pattern.permute.xlu1 %v1097_v19  ;;  %v153_v24 = vsel %vm1339_vm11, %v1384_v10, 0 }
  0x9f   :  { %vm298_vm13 = vmpackc.low %vm296_vm12, %vm296_vm12  ;;  %350 = vperm.xlu1 %1024, %v1154_v7   ;;  %vm189_vm12 = vcmp.eq.s32.totalorder %v187_v35, 1 }
  0xa0   :  { %v300_v28 = vsel %vm298_vm13, %v1263_v25, 0  ;;  %vm1355_vm2 = vmpackc.low %vm189_vm12, %vm189_vm12 }
  0xa1   :  { %v1270_v29 = vadd.bf16 %v300_v28, %v288_v27  ;;  %v1272_v30 = vpop.permute.xlu1 %294  ;;  %v1297_v45 = vpop.permute.xlu0 %254  ;;  %v1986_v0 = vsel %vm1355_vm2, 4294967295, %v1985_v0 }
  0xa2   :  { %vm297_vm9 = vcmp.eq.s32.totalorder %v1272_v30, 1 }
  0xa3   :  { %359 = vperm.xlu1 %1024, %v1143_v4  }
  0xa6   :  { %v1275_v32 = vpop.permute.xlu1 %78  ;;  %v283_v47 = vpop.permute.xlu0 %282 }
  0xa7   :  { %1025 = vset.pattern.permute.xlu1 %v1095_v17  ;;  %vm285_vm13 = vcmp.eq.s32.totalorder %v283_v47, 1  ;;  %v1451_v47 = vld [vmem:[#allocation2 + $0x18] sm:$0xf] }
  0xa8   :  { %483 = vperm.xlu1 %1025, %v1146_v5   ;;  %vm1359_vm3 = vmpackc.low %vm285_vm13, %vm285_vm13  ;;  %v1368_v5 = vld [vmem:[#allocation2 + $0xc] sm:$0xf] }
  0xa9   :  { %v289_v27 = vsel %vm1359_vm3, %v1384_v10, 0 }
  0xaa   :  { %v309_v49 = vpop.permute.xlu0 %308 }
  0xab   :  { %v212_v34 = vpop.permute.xlu1 %211 }
  0xac   :  { %vm216_vm14 = vcmp.eq.s32.totalorder %v212_v34, 1  ;;  %495 = vperm.xlu1 %1025, %v1143_v4   ;;  %v1989_v4 = vmov 0  ;;  %v1432_v34 = vld [vmem:[#allocation2 + $0x1c] sm:$0xf] }
  0xad   :  { %vm218_vm15 = vmpackc.low %vm216_vm14, %vm216_vm14 }
  0xae   :  { %v220_v38 = vsel %vm218_vm15, %v1265_v26, 0  ;;  %v334_v51 = vpop.permute.xlu0 %333  ;;  %vm1343_vm14 = vmpackc.low %vm161_vm7, %vm161_vm7  ;;  %vm81_vm15 = vcmp.eq.s32.totalorder %v1275_v32, 1  ;;  %v178_v32 = vsel %vm1335_vm10, %v1398_v20, 0 }
  0xaf   :  { %v224_v36 = vpop.permute.xlu1 %223  ;;  %vm338_vm4 = vcmp.eq.s32.totalorder %v334_v51, 1  ;;  %vm1364_vm7 = vmpackc.low %vm81_vm15, %vm81_vm15  ;;  %v165_v21 = vsel %vm1343_vm14, %v1368_v5, 0 }
  0xb0   :  { %vm228_vm0 = vcmp.eq.s32.totalorder %v224_v36, 1  ;;  %498 = vperm.xlu1 %1025, %v1162_v9   ;;  %v1990_v4 = vsel %vm1364_vm7, 4294967295, %v1989_v4  ;;  %vm1374_vm2 = vmpackc.low %vm338_vm4, %vm338_vm4  ;;  %v167_v33 = vadd.bf16 %v165_v21, %v153_v24 }
  0xb1   :  { %vm230_vm1 = vmpackc.low %vm228_vm0, %vm228_vm0 }
  0xb2   :  { %v232_v39 = vsel %vm230_vm1, %v1263_v25, 0  ;;  %vm1350_vm0 = vmpackc.low %vm297_vm9, %vm297_vm9  ;;  %vm311_vm1 = vcmp.eq.s32.totalorder %v309_v49, 1 }
  0xb3   :  { %v1285_v40 = vadd.bf16 %v232_v39, %v220_v38  ;;  %v1287_v41 = vpop.permute.xlu1 %226  ;;  %v60_v54 = vpop.permute.xlu0 %59  ;;  %v1984_v63 = vsel %vm1350_vm0, 4294967295, %v1983_v63  ;;  %vm1370_vm12 = vmpackc.low %vm311_vm1, %vm311_vm1 }
  0xb4   :  { %1026 = vset.pattern.permute.xlu1 %v1094_v16  ;;  %vm64_vm5 = vcmp.eq.s32.totalorder %v60_v54, 1 }
  0xb5   :  { %444 = vperm.xlu1 %1026, %v1179_v12   ;;  %vm1378_vm0 = vmpackc.low %vm64_vm5, %vm64_vm5 }
  0xb6   :  { %v68_v60 = vsel %vm1378_vm0, %v1265_v26, 0 }
  0xb7   :  { %v63_v58 = vpop.permute.xlu0 %62 }
  0xb8   :  { %v173_v43 = vpop.permute.xlu1 %172  ;;  %vm65_vm13 = vcmp.eq.s32.totalorder %v63_v58, 1 }
  0xb9   :  { %1027 = vset.pattern.permute.xlu1 %v1096_v18  ;;  %vm175_vm9 = vcmp.eq.s32.totalorder %v173_v43, 1  ;;  %vm1403_vm4 = vmpackc.low %vm65_vm13, %vm65_vm13 }
  0xba   :  { %577 = vperm.xlu1 %1027, %v1151_v6   ;;  %vm1386_vm7 = vmpackc.low %vm175_vm9, %vm175_vm9 }
  0xbb   :  { %v76_v3 = vpop.permute.xlu0 %75 }
  0xbc   :  { %vm80_vm15 = vcmp.eq.s32.totalorder %v76_v3, 1  ;;  %v342_v3 = vsel %vm1374_vm2, %v1462_v56, 0 }
  0xbd   :  { %v1295_v44 = vpop.permute.xlu1 %305 }
  0xbe   :  { %1028 = vset.pattern.permute.xlu1 %v1097_v19  ;;  %vm310_vm1 = vcmp.eq.s32.totalorder %v1295_v44, 1 }
  0xbf   :  { %373 = vperm.xlu1 %1028, %v1151_v6   ;;  %vm1425_vm14 = vmpackc.low %vm310_vm1, %vm310_vm1  ;;  %v112_v49 = vpop.permute.xlu0 %111 }
  0xc0   :  { %v314_v61 = vsel %vm1425_vm14, %v1398_v20, 0 }
  0xc2   :  { %v1301_v46 = vpop.permute.xlu1 %93 }
  0xc3   :  { %376 = vperm.xlu1 %1028, %v1179_v12   ;;  %v133_v11 = vpop.permute.xlu0 %132 }
  0xc6   :  { %v1304_v48 = vpop.permute.xlu1 %96 }
  0xc7   :  { %1029 = vset.pattern.permute.xlu1 %v1095_v17  ;;  %vm99_vm10 = vcmp.eq.s32.totalorder %v1304_v48, 1 }
  0xc8   :  { %512 = vperm.xlu1 %1029, %v1179_v12   ;;  %v164_v12 = vsel %vm1324_vm6, %v1263_v25, 0  ;;  %vm1411_vm6 = vmpackc.low %vm80_vm15, %vm80_vm15 }
  0xcb   :  { %v1308_v50 = vpop.permute.xlu1 %240 }
  0xcc   :  { %1030 = vset.pattern.permute.xlu1 %v1094_v16 }
  0xcd   :  { %455 = vperm.xlu1 %1030, %v1198_v14  }
  0xd0   :  { %v1312_v52 = vpop.permute.xlu1 %183 }
  0xd1   :  { %1032 = vset.pattern.permute.xlu1 %v1096_v18  ;;  %vm188_vm5 = vcmp.eq.s32.totalorder %v1312_v52, 1 }
  0xd2   :  { %591 = vperm.xlu1 %1032, %v1198_v14   ;;  %vm1434_vm11 = vmpackc.low %vm188_vm5, %vm188_vm5  ;;  %vm217_vm5 = vcmp.eq.s32.totalorder %v1281_v37, 1 }
  0xd3   :  { %v192_v57 = vsel %vm1434_vm11, %v1451_v47, 0  ;;  %vm1486_vm11 = vmpackc.low %vm99_vm10, %vm99_vm10  ;;  %vm116_vm10 = vcmp.eq.s32.totalorder %v112_v49, 1 }
  0xd5   :  { %v1316_v53 = vpop.permute.xlu1 %319 }
  0xd6   :  { %594 = vperm.xlu1 %1032, %v1159_v8   ;;  %vm324_vm3 = vcmp.eq.s32.totalorder %v1316_v53, 1 }
  0xd9   :  { %v1320_v55 = vpop.permute.xlu1 %322 }
  0xda   :  { %1033 = vset.pattern.permute.xlu1 %v1097_v19  ;;  %vm325_vm15 = vcmp.eq.s32.totalorder %v1320_v55, 1 }
  0xdb   :  { %390 = vperm.xlu1 %1033, %v1159_v8   ;;  %v1508_v8 = vld [vmem:[#allocation2 + $0x24] sm:$0xf] }
  0xde   :  { %v1348_v62 = vpop.permute.xlu1 %114 }
  0xdf   :  { %1034 = vset.pattern.permute.xlu1 %v1095_v17  ;;  %vm117_vm0 = vcmp.eq.s32.totalorder %v1348_v62, 1 }
  0xe0   :  { %523 = vperm.xlu1 %1034, %v1198_v14   ;;  %v152_v14 = vsel %vm1330_vm8, %v1265_v26, 0  ;;  %vm98_vm8 = vcmp.eq.s32.totalorder %v1301_v46, 1  ;;  %vm1522_vm2 = vmpackc.low %vm117_vm0, %vm117_vm0 }
  0xe1   :  { %v166_v31 = vadd.bf16 %v164_v12, %v152_v14  ;;  %vm1445_vm9 = vmpackc.low %vm98_vm8, %vm98_vm8  ;;  %v316_v14 = vadd.bf16 %v314_v61, %v1270_v29 }
  0xe2   :  { %vm1470_vm8 = vmpackc.low %vm324_vm3, %vm324_vm3 }
  0xe3   :  { %v1382_v9 = vpop.permute.xlu1 %251  ;;  %v180_v52 = vadd.bf16 %v178_v32, %v166_v31  ;;  %vm1493_vm3 = vmpackc.low %vm325_vm15, %vm325_vm15  ;;  %v328_v6 = vsel %vm1470_vm8, %v1451_v47, 0  ;;  %vm229_vm15 = vcmp.eq.s32.totalorder %v1287_v41, 1 }
  0xe4   :  { %1036 = vset.pattern.permute.xlu1 %v1094_v16  ;;  %v1409_v16 = vld [vmem:[#allocation2 + $0x14] sm:$0xf]  ;;  %v329_v23 = vsel %vm1493_vm3, %v1432_v34, 0  ;;  %v330_v30 = vadd.bf16 %v328_v6, %v316_v14  ;;  %vm257_vm3 = vcmp.eq.s32.totalorder %v1297_v45, 1 }
  0xe5   :  { %469 = vperm.xlu1 %1036, %v1185_v13   ;;  %v179_v28 = vsel %vm1386_vm7, %v1409_v16, 0  ;;  %vm2007_vm7 = vnez %v1984_v63  ;;  %v315_v39 = vsel %vm1370_vm12, %v1409_v16, 0  ;;  %vm2012_vm12 = vnez %v1986_v0 }
  0xe6   :  { %v301_v38 = vsel %vm2007_vm7, %v1368_v5, 0  ;;  %v181_v46 = vadd.bf16 %v179_v28, %v167_v33  ;;  %v193_v54 = vsel %vm2012_vm12, %v1432_v34, 0  ;;  %vm2015_vm7 = vnez %v1990_v4 }
  0xe7   :  { %v303_v44 = vadd.bf16 %v301_v38, %v289_v27  ;;  %v85_v58 = vsel %vm2015_vm7, %v1368_v5, 0  ;;  %v84_v0 = vsel %vm1411_vm6, %v1263_v25, 0  ;;  %v194_v4 = vadd.bf16 %v192_v57, %v180_v52  ;;  %vm1561_vm7 = vmpackc.low %vm229_vm15, %vm229_vm15 }
  0xe8   :  { %v198_v36 = vpop.permute.xlu1 %197  ;;  %v195_v12 = vadd.bf16 %v193_v54, %v181_v46  ;;  %v86_v21 = vadd.bf16 %v84_v0, %v68_v60  ;;  %v102_v28 = vsel %vm1445_vm9, %v1398_v20, 0  ;;  %v103_v62 = vsel %vm1486_vm11, %v1409_v16, 0 }
  0xe9   :  { %vm202_vm13 = vcmp.eq.s32.totalorder %v198_v36, 1  ;;  %472 = vperm.xlu1 %1036, %v1203_v15   ;;  %v317_v59 = vadd.bf16 %v315_v39, %v303_v44  ;;  %v121_v36 = vsel %vm1522_vm2, %v1432_v34, 0  ;;  %vm242_vm11 = vcmp.eq.s32.totalorder %v1291_v42, 1 }
  0xea   :  { %vm1454_vm1 = vmpackc.low %vm202_vm13, %vm202_vm13  ;;  %vm135_vm13 = vcmp.eq.s32.totalorder %v133_v11, 1  ;;  %v104_v38 = vadd.bf16 %v102_v28, %v86_v21  ;;  %v233_v45 = vsel %vm1561_vm7, %v1368_v5, 0  ;;  %v416_v28 = vpop.permute.xlu0 %415 }
  0xeb   :  { %v206_v48 = vsel %vm1454_vm1, %v1462_v56, 0  ;;  %vm1540_vm1 = vmpackc.low %vm116_vm10, %vm116_vm10  ;;  %v331_v35 = vadd.bf16 %v329_v23, %v317_v59 }
  0xec   :  { %v201_v63 = vpop.permute.xlu1 %200  ;;  %v208_v27 = vadd.bf16 %v206_v48, %v194_v4  ;;  %vm1552_vm8 = vmpackc.low %vm135_vm13, %vm135_vm13  ;;  %v120_v46 = vsel %vm1540_vm1, %v1451_v47, 0  ;;  %v1618_v4 = vld [vmem:[%s1968_s2] sm:$0xff]  }
  0xed   :  { %vm203_vm14 = vcmp.eq.s32.totalorder %v201_v63, 1  ;;  %1038 = vset.pattern.permute.xlu1 %v1096_v18  ;;  %v69_v18 = vsel %vm1403_vm4, %v1384_v10, 0  ;;  %vm1529_vm4 = vmpackc.low %vm217_vm5, %vm217_vm5  ;;  %vm243_vm5 = vcmp.eq.s32.totalorder %v1308_v50, 1  ;;  %v344_v50 = vadd.bf16 %v342_v3, %v330_v30 }
  0xee   :  { %vm205_vm6 = vmpackc.low %vm203_vm14, %vm203_vm14  ;;  %608 = vperm.xlu1 %1038, %v1203_v15   ;;  %v87_v32 = vadd.bf16 %v85_v58, %v69_v18  ;;  %v139_v41 = vsel %vm1552_vm8, %v1508_v8, 0  ;;  %v221_v42 = vsel %vm1529_vm4, %v1384_v10, 0  ;;  %v122_v55 = vadd.bf16 %v120_v46, %v104_v38 }
  0xef   :  { %v207_v7 = vsel %vm205_vm6, %v1508_v8, 0  ;;  %vm1570_vm0 = vmpackc.low %vm243_vm5, %vm243_vm5  ;;  %vm256_vm6 = vcmp.eq.s32.totalorder %v1382_v9, 1  ;;  %v235_v53 = vadd.bf16 %v233_v45, %v221_v42  ;;  %v2044_v3 = vmov 0 }
  0xf0   :  { %v209_v22 = vadd.bf16 %v207_v7, %v195_v12  ;;  %v105_v39 = vadd.bf16 %v103_v62, %v87_v32  ;;  %vm1588_vm2 = vmpackc.low %vm242_vm11, %vm242_vm11  ;;  %v247_v60 = vsel %vm1570_vm0, %v1409_v16, 0 }
  0xf1   :  { %v337_v31 = vpop.permute.xlu1 %336  ;;  %vm1594_vm13 = vmpackc.low %vm257_vm3, %vm257_vm3  ;;  %v246_v0 = vsel %vm1588_vm2, %v1398_v20, 0  ;;  %v249_v48 = vadd.bf16 %v247_v60, %v235_v53  ;;  %vm420_vm2 = vcmp.eq.s32.totalorder %v416_v28, 1 }
  0xf2   :  { %vm339_vm12 = vcmp.eq.s32.totalorder %v337_v31, 1  ;;  %1039 = vset.pattern.permute.xlu1 %v1097_v19  ;;  %v1545_v33 = vcombine.low %v208_v27, %v209_v22  ;;  %v123_v51 = vadd.bf16 %v121_v36, %v105_v39  ;;  %vm1601_vm4 = vmpackc.low %vm256_vm6, %vm256_vm6  ;;  %v261_v6 = vsel %vm1594_vm13, %v1432_v34, 0 }
  0xf3   :  { %vm341_vm9 = vmpackc.low %vm339_vm12, %vm339_vm12  ;;  %401 = vperm.xlu1 %1039, %v1185_v13   ;;  %vm1972_vm12 = vcmask 130048   ;;  %v248_v11 = vadd.bf16 %v246_v0, %v1285_v40  ;;  %v263_v7 = vadd.bf16 %v261_v6, %v249_v48 }
  0xf4   :  { %v343_v19 = vsel %vm341_vm9, %v1508_v8, 0  ;;  %689 = vmatprep.subr.bf16.mxu0 %v1545_v33  ;;  %v141_v9 = vadd.bf16 %v139_v41, %v123_v51 }
  0xf5   :  { %v345_v49 = vadd.bf16 %v343_v19, %v331_v35  ;;  %v431_v35 = vpop.permute.xlu0 %430 }
  0xf6   :  { %v130_v52 = vpop.permute.xlu1 %129  ;;  %vm433_vm13 = vcmp.eq.s32.totalorder %v431_v35, 1 }
  0xf7   :  { %vm134_vm14 = vcmp.eq.s32.totalorder %v130_v52, 1  ;;  %1040 = vset.pattern.permute.xlu1 %v1095_v17  ;;  %v1578_v57 = vcombine.low %v344_v50, %v345_v49 }
  0xf8   :  { %vm136_vm10 = vmpackc.low %vm134_vm14, %vm134_vm14  ;;  %537 = vperm.xlu1 %1040, %v1185_v13  }
  0xf9   :  { %v138_v17 = vsel %vm136_vm10, %v1462_v56, 0  ;;  %732 = vmatprep.subr.bf16.mxu1 %v1578_v57  ;;  %v442_v38 = vpop.permute.xlu0 %441 }
  0xfa   :  { %v140_v61 = vadd.bf16 %v138_v17, %v122_v55 }
  0xfb   :  { %v266_v63 = vpop.permute.xlu1 %265 }
  0xfc   :  { %vm270_vm15 = vcmp.eq.s32.totalorder %v266_v63, 1  ;;  %540 = vperm.xlu1 %1040, %v1203_v15   ;;  %v1609_v2 = vcombine.low %v140_v61, %v141_v9  ;;  %v260_v15 = vsel %vm1601_vm4, %v1451_v47, 0  ;;  %vm446_vm4 = vcmp.eq.s32.totalorder %v442_v38, 1 }
  0xfd   :  { %vm1611_vm1 = vmpackc.low %vm270_vm15, %vm270_vm15  ;;  %v262_v14 = vadd.bf16 %v260_v15, %v248_v11  ;;  %v2046_v15 = vmov 0 }
  0xfe   :  { %690 = vmatpush1.bf16.msra.mxu0 %v1609_v2  ;;  %v274_v18 = vsel %vm1611_vm1, %v1462_v56, 0  ;;  %vm1673_vm15 = vmpackc.low %vm420_vm2, %vm420_vm2 }
  0xff   :  { %v269_v12 = vpop.permute.xlu1 %268  ;;  %v276_v23 = vadd.bf16 %v274_v18, %v262_v14  ;;  %v2052_v18 = vmov 0 }
 0x100   :  { %vm271_vm9 = vcmp.eq.s32.totalorder %v269_v12, 1 }
 0x101   :  { %vm273_vm5 = vmpackc.low %vm271_vm9, %vm271_vm9  ;;  %984 = vmatmul.mubr.msk.bf16.vlgmr.msra.gmra.mxu0 %vm1972_vm12, %v1618_v4 }
 0x102   :  { %v275_v21 = vsel %vm273_vm5, %v1508_v8, 0  ;;  %793 = vmatprep.mubr.bf16.mxu0 %v1091_v1  ;;  %vm1677_vm5 = vmpackc.low %vm433_vm13, %vm433_vm13 }
 0x103   :  { %v277_v24 = vadd.bf16 %v275_v21, %v263_v7  ;;  %v437_v28 = vsel %vm1677_vm5, %v1368_v5, 0 }
 0x104   :  { %v1635_v27 = vpop.permute.xlu1 %418 }
 0x105   :  { %v1637_v40 = vcombine.low %v276_v23, %v277_v24 }
 0x107   :  { %733 = vmatpush1.bf16.msra.mxu1 %v1637_v40 }
 0x108   :  { %v1640_v22 = vpop.permute.xlu1 %427 }
 0x10a   :  { %985 = vmatmul.mubr.msk.bf16.vlgmr.msra.gmra.mxu1 %vm1972_vm12, %v1618_v4 }
 0x10b   :  { %836 = vmatprep.mubr.bf16.mxu1 %v1091_v1  ;;  %v459_v1 = vpop.permute.xlu0 %458 }
 0x10c   :  { %vm461_vm1 = vcmp.eq.s32.totalorder %v459_v1, 1 }
 0x10d   :  { %v552_v29 = vpop.permute.xlu1 %551 }
 0x10e   :  { %vm556_vm8 = vcmp.eq.s32.totalorder %v552_v29, 1 }
 0x10f   :  { %vm558_vm7 = vmpackc.low %vm556_vm8, %vm556_vm8  ;;  %v1653_v44 = vpop.permute.xlu0 %486 }
 0x110   :  { %v560_v30 = vsel %vm558_vm7, %v1265_v26, 0 }
 0x111   :  { %v564_v62 = vpop.permute.xlu1 %563 }
 0x112   :  { %vm568_vm11 = vcmp.eq.s32.totalorder %v564_v62, 1 }
 0x113   :  { %vm570_vm3 = vmpackc.low %vm568_vm11, %vm568_vm11  ;;  %v1661_v52 = vpop.permute.xlu0 %509 }
 0x114   :  { %v572_v31 = vsel %vm570_vm3, %v1263_v25, 0  ;;  %vm1681_vm3 = vmpackc.low %vm446_vm4, %vm446_vm4 }
 0x115   :  { %v1647_v32 = vadd.bf16 %v572_v31, %v560_v30  ;;  %v567_v37 = vpop.permute.xlu1 %566  ;;  %v2045_v3 = vsel %vm1681_vm3, 4294967295, %v2044_v3 }
 0x116   :  { %vm569_vm12 = vcmp.eq.s32.totalorder %v567_v37, 1 }
 0x117   :  { %v1663_v41 = vpop.permute.xlu0 %526 }
 0x11a   :  { %v1649_v36 = vpop.permute.xlu1 %350 }
 0x11b   :  { %v555_v55 = vpop.permute.xlu0 %554 }
 0x11c   :  { %vm557_vm9 = vcmp.eq.s32.totalorder %v555_v55, 1 }
 0x11d   :  { %vm1693_vm2 = vmpackc.low %vm557_vm9, %vm557_vm9 }
 0x11e   :  { %v1651_v39 = vpop.permute.xlu1 %359 }
 0x11f   :  { %v581_v17 = vpop.permute.xlu0 %580 }
 0x120   :  { %vm583_vm8 = vcmp.eq.s32.totalorder %v581_v17, 1 }
 0x121   :  { %vm1697_vm13 = vmpackc.low %vm583_vm8, %vm583_vm8 }
 0x123   :  { %v484_v43 = vpop.permute.xlu1 %483  ;;  %v606_v60 = vpop.permute.xlu0 %605 }
 0x124   :  { %vm488_vm0 = vcmp.eq.s32.totalorder %v484_v43, 1  ;;  %vm610_vm7 = vcmp.eq.s32.totalorder %v606_v60, 1 }
 0x125   :  { %vm490_vm14 = vmpackc.low %vm488_vm0, %vm488_vm0  ;;  %vm421_vm0 = vcmp.eq.s32.totalorder %v1635_v27, 1 }
 0x126   :  { %v492_v46 = vsel %vm490_vm14, %v1265_v26, 0  ;;  %vm1701_vm4 = vmpackc.low %vm610_vm7, %vm610_vm7  ;;  %vm353_vm7 = vcmp.eq.s32.totalorder %v1649_v36, 1 }
 0x127   :  { %v496_v19 = vpop.permute.xlu1 %495  ;;  %v348_v61 = vpop.permute.xlu0 %347  ;;  %v2053_v18 = vsel %vm1701_vm4, 4294967295, %v2052_v18  ;;  %vm1722_vm4 = vmpackc.low %vm569_vm12, %vm569_vm12 }
 0x128   :  { %vm500_vm6 = vcmp.eq.s32.totalorder %v496_v19, 1  ;;  %vm352_vm11 = vcmp.eq.s32.totalorder %v348_v61, 1  ;;  %vm1745_vm12 = vmpackc.low %vm353_vm7, %vm353_vm7 }
 0x129   :  { %vm502_vm10 = vmpackc.low %vm500_vm6, %vm500_vm6  ;;  %v357_v7 = vsel %vm1745_vm12, %v1384_v10, 0 }
 0x12a   :  { %v504_v50 = vsel %vm502_vm10, %v1263_v25, 0  ;;  %vm1688_vm6 = vmpackc.low %vm461_vm1, %vm461_vm1  ;;  %vm432_vm10 = vcmp.eq.s32.totalorder %v1640_v22, 1  ;;  %v424_v22 = vsel %vm1673_vm15, %v1265_v26, 0 }
 0x12b   :  { %v1657_v49 = vadd.bf16 %v504_v50, %v492_v46  ;;  %v1659_v51 = vpop.permute.xlu1 %498  ;;  %v363_v63 = vpop.permute.xlu0 %362  ;;  %v2047_v15 = vsel %vm1688_vm6, 4294967295, %v2046_v15  ;;  %vm1705_vm3 = vmpackc.low %vm352_vm11, %vm352_vm11  ;;  %vm364_vm11 = vcmp.eq.s32.totalorder %v1651_v39, 1  ;;  %v561_v50 = vsel %vm1693_vm2, %v1384_v10, 0 }
 0x12c   :  { %vm365_vm14 = vcmp.eq.s32.totalorder %v363_v63, 1  ;;  %vm1709_vm1 = vmpackc.low %vm421_vm0, %vm421_vm0  ;;  %vm489_vm2 = vcmp.eq.s32.totalorder %v1653_v44, 1  ;;  %v356_v63 = vsel %vm1705_vm3, %v1265_v26, 0 }
 0x12d   :  { %vm1713_vm9 = vmpackc.low %vm365_vm14, %vm365_vm14  ;;  %v425_v62 = vsel %vm1709_vm1, %v1384_v10, 0 }
 0x12e   :  { %vm1717_vm6 = vmpackc.low %vm432_vm10, %vm432_vm10  ;;  %v439_v39 = vadd.bf16 %v437_v28, %v425_v62  ;;  %v848_v62 = vunpack.c.l.bf16 %v1545_v33 }
 0x12f   :  { %v436_v30 = vsel %vm1717_vm6, %v1263_v25, 0  ;;  %vm1749_vm10 = vmpackc.low %vm364_vm11, %vm364_vm11  ;;  %vm2072_vm6 = vnez %v2045_v3  ;;  %v388_v43 = vpop.permute.xlu0 %387 }
 0x130   :  { %v445_v54 = vpop.permute.xlu1 %444  ;;  %v450_v38 = vsel %vm2072_vm6, %v1398_v20, 0  ;;  %v438_v1 = vadd.bf16 %v436_v30, %v424_v22  ;;  %vm2080_vm6 = vnez %v2053_v18 }
 0x131   :  { %vm447_vm8 = vcmp.eq.s32.totalorder %v445_v54, 1  ;;  %v573_v54 = vsel %vm1722_vm4, %v1368_v5, 0  ;;  %v614_v61 = vsel %vm2080_vm6, %v1462_v56, 0 }
 0x132   :  { %vm1732_vm0 = vmpackc.low %vm447_vm8, %vm447_vm8  ;;  %v575_v3 = vadd.bf16 %v573_v54, %v561_v50 }
 0x133   :  { %v451_v35 = vsel %vm1732_vm0, %v1409_v16, 0  ;;  %v405_v12 = vpop.permute.xlu0 %404 }
 0x134   :  { %v453_v17 = vadd.bf16 %v451_v35, %v439_v39 }
 0x135   :  { %v578_v42 = vpop.permute.xlu1 %577 }
 0x136   :  { %vm582_vm14 = vcmp.eq.s32.totalorder %v578_v42, 1  ;;  %v858_v42 = vunpack.c.h.bf16 %v1578_v57 }
 0x137   :  { %vm1756_vm5 = vmpackc.low %vm582_vm14, %vm582_vm14 }
 0x138   :  { %v586_v26 = vsel %vm1756_vm5, %v1398_v20, 0 }
 0x139   :  { %v588_v24 = vadd.bf16 %v586_v26, %v1647_v32 }
 0x13a   :  { %v374_v45 = vpop.permute.xlu1 %373 }
 0x13b   :  { %vm378_vm8 = vcmp.eq.s32.totalorder %v374_v45, 1  ;;  %v944_v45 = vld [vmem:[%s1969_s3] sm:$0xff] }
 0x13c   :  { %vm1774_vm11 = vmpackc.low %vm378_vm8, %vm378_vm8  ;;  %947 = vperm.xlu0 %1041, %v944_v45  }
 0x13d   :  { %v382_v37 = vsel %vm1774_vm11, %v1398_v20, 0 }
 0x13e   :  { %v1665_v58 = vpop.permute.xlu1 %376 }
 0x13f   :  { %vm379_vm0 = vcmp.eq.s32.totalorder %v1665_v58, 1 }
 0x140   :  { %vm1819_vm3 = vmpackc.low %vm379_vm0, %vm379_vm0  ;;  %vm407_vm0 = vcmp.eq.s32.totalorder %v405_v12, 1 }
 0x141   :  { %v383_v35 = vsel %vm1819_vm3, %v1409_v16, 0  ;;  %vm1880_vm6 = vmpackc.low %vm407_vm0, %vm407_vm0  ;;  %vm514_vm3 = vcmp.eq.s32.totalorder %v1661_v52, 1 }
 0x142   :  { %vm1911_vm0 = vmpackc.low %vm514_vm3, %vm514_vm3 }
 0x143   :  { %v1667_v59 = vpop.permute.xlu1 %512 }
 0x148   :  { %v456_v9 = vpop.permute.xlu1 %455 }
 0x149   :  { %vm460_vm15 = vcmp.eq.s32.totalorder %v456_v9, 1  ;;  %v587_v9 = vsel %vm1697_vm13, %v1409_v16, 0  ;;  %vm392_vm13 = vcmp.eq.s32.totalorder %v388_v43, 1 }
 0x14a   :  { %vm1763_vm1 = vmpackc.low %vm460_vm15, %vm460_vm15  ;;  %vm2077_vm15 = vnez %v2047_v15  ;;  %v369_v15 = vsel %vm1713_vm9, %v1368_v5, 0  ;;  %v589_v29 = vadd.bf16 %v587_v9, %v575_v3 }
 0x14b   :  { %v465_v55 = vsel %vm2077_vm15, %v1432_v34, 0  ;;  %v464_v0 = vsel %vm1763_vm1, %v1451_v47, 0  ;;  %v371_v32 = vadd.bf16 %v369_v15, %v357_v7  ;;  %vm501_vm15 = vcmp.eq.s32.totalorder %v1659_v51, 1 }
 0x14c   :  { %v467_v23 = vadd.bf16 %v465_v55, %v453_v17 }
 0x14d   :  { %v1669_v53 = vpop.permute.xlu1 %591  ;;  %v385_v54 = vadd.bf16 %v383_v35, %v371_v32 }
 0x14e   :  { %vm596_vm7 = vcmp.eq.s32.totalorder %v1669_v53, 1  ;;  %v452_v53 = vadd.bf16 %v450_v38, %v438_v1 }
 0x150   :  { %v466_v21 = vadd.bf16 %v464_v0, %v452_v53  ;;  %v518_v53 = vsel %vm1911_vm0, %v1398_v20, 0 }
 0x151   :  { %v1671_v13 = vpop.permute.xlu1 %594 }
 0x152   :  { %vm597_vm4 = vcmp.eq.s32.totalorder %v1671_v13, 1 }
 0x153   :  { %vm1826_vm1 = vmpackc.low %vm597_vm4, %vm597_vm4 }
 0x154   :  { %v601_v28 = vsel %vm1826_vm1, %v1432_v34, 0 }
 0x155   :  { %v603_v19 = vadd.bf16 %v601_v28, %v589_v29 }
 0x156   :  { %v1686_v6 = vpop.permute.xlu1 %390 }
 0x157   :  { %vm393_vm9 = vcmp.eq.s32.totalorder %v1686_v6, 1  ;;  %v368_v6 = vsel %vm1749_vm10, %v1263_v25, 0  ;;  %vm1855_vm10 = vmpackc.low %vm489_vm2, %vm489_vm2 }
 0x158   :  { %vm1848_vm12 = vmpackc.low %vm393_vm9, %vm393_vm9  ;;  %v370_v39 = vadd.bf16 %v368_v6, %v356_v63  ;;  %v411_v63 = vsel %vm1880_vm6, %v1508_v8, 0 }
 0x159   :  { %vm1868_vm2 = vmpackc.low %vm392_vm13, %vm392_vm13  ;;  %vm529_vm13 = vcmp.eq.s32.totalorder %v1663_v41, 1 }
 0x15a   :  { %v384_v50 = vadd.bf16 %v382_v37, %v370_v39  ;;  %v396_v45 = vsel %vm1868_vm2, %v1451_v47, 0 }
 0x15b   :  { %v1727_v27 = vpop.permute.xlu1 %523 }
 0x15c   :  { %v398_v41 = vadd.bf16 %v396_v45, %v384_v50 }
 0x160   :  { %v470_v46 = vpop.permute.xlu1 %469 }
 0x161   :  { %vm474_vm14 = vcmp.eq.s32.totalorder %v470_v46, 1  ;;  %v397_v46 = vsel %vm1848_vm12, %v1432_v34, 0  ;;  %vm1917_vm12 = vmpackc.low %vm529_vm13, %vm529_vm13 }
 0x162   :  { %vm1787_vm8 = vmpackc.low %vm474_vm14, %vm474_vm14  ;;  %v399_v17 = vadd.bf16 %v397_v46, %v385_v54  ;;  %v533_v14 = vsel %vm1917_vm12, %v1432_v34, 0 }
 0x163   :  { %vm1806_vm14 = vmpackc.low %vm596_vm7, %vm596_vm7  ;;  %v478_v58 = vsel %vm1787_vm8, %v1462_v56, 0  ;;  %vm515_vm8 = vcmp.eq.s32.totalorder %v1667_v59, 1 }
 0x164   :  { %v473_v18 = vpop.permute.xlu1 %472  ;;  %v600_v13 = vsel %vm1806_vm14, %v1451_v47, 0  ;;  %v480_v30 = vadd.bf16 %v478_v58, %v466_v21  ;;  %vm1886_vm14 = vmpackc.low %vm501_vm15, %vm501_vm15  ;;  %v520_v58 = vadd.bf16 %v518_v53, %v1657_v49  ;;  %v847_v49 = vunpack.c.l.bf16 %v1609_v2 }
 0x165   :  { %vm475_vm5 = vcmp.eq.s32.totalorder %v473_v18, 1  ;;  %v602_v36 = vadd.bf16 %v600_v13, %v588_v24  ;;  %vm1895_vm1 = vmpackc.low %vm515_vm8, %vm515_vm8  ;;  %v505_v52 = vsel %vm1886_vm14, %v1368_v5, 0  ;;  %vm2103_vm8 = vcmask 130048  }
 0x166   :  { %vm477_vm7 = vmpackc.low %vm475_vm5, %vm475_vm5  ;;  %vm528_vm5 = vcmp.eq.s32.totalorder %v1727_v27, 1  ;;  %v519_v5 = vsel %vm1895_vm1, %v1409_v16, 0 }
 0x167   :  { %v479_v22 = vsel %vm477_vm7, %v1508_v8, 0  ;;  %v616_v55 = vadd.bf16 %v614_v61, %v602_v36  ;;  %v493_v61 = vsel %vm1855_vm10, %v1384_v10, 0  ;;  %v413_v10 = vadd.bf16 %v411_v63, %v399_v17  ;;  %vm530_vm10 = vmpackc.low %vm528_vm5, %vm528_vm5 }
 0x168   :  { %v481_v31 = vadd.bf16 %v479_v22, %v467_v23  ;;  %v507_v27 = vadd.bf16 %v505_v52, %v493_v61  ;;  %v532_v16 = vsel %vm530_vm10, %v1451_v47, 0  ;;  %vm2104_vm6 = vmmov %vm2103_vm8  ;;  %v855_v22 = vunpack.c.h.bf16 %v1609_v2 }
 0x169   :  { %v609_v38 = vpop.permute.xlu1 %608  ;;  %v534_v20 = vadd.bf16 %v532_v16, %v520_v58  ;;  %v857_v2 = vunpack.c.h.bf16 %v1637_v40 }
 0x16a   :  { %vm611_vm4 = vcmp.eq.s32.totalorder %v609_v38, 1  ;;  %v1872_v1 = vcombine.low %v480_v30, %v481_v31  ;;  %v521_v18 = vadd.bf16 %v519_v5, %v507_v27  ;;  %v856_v30 = vunpack.c.h.bf16 %v1545_v33 }
 0x16b   :  { %vm613_vm11 = vmpackc.low %vm611_vm4, %vm611_vm4  ;;  %v850_v33 = vunpack.c.l.bf16 %v1578_v57 }
 0x16c   :  { %v615_v43 = vsel %vm613_vm11, %v1508_v8, 0  ;;  %775 = vmatprep.subr.bf16.mxu0 %v1872_v1  ;;  %v535_v13 = vadd.bf16 %v533_v14, %v521_v18 }
 0x16d   :  { %v617_v59 = vadd.bf16 %v615_v43, %v603_v19  ;;  %v849_v19 = vunpack.c.l.bf16 %v1637_v40 }
 0x16e   :  { %v402_v60 = vpop.permute.xlu1 %401 }
 0x16f   :  { %vm406_vm9 = vcmp.eq.s32.totalorder %v402_v60, 1  ;;  %v1902_v0 = vcombine.low %v616_v55, %v617_v59 }
 0x170   :  { %vm408_vm7 = vmpackc.low %vm406_vm9, %vm406_vm9 }
 0x171   :  { %v410_v3 = vsel %vm408_vm7, %v1462_v56, 0  ;;  %818 = vmatprep.subr.bf16.mxu1 %v1902_v0 }
 0x172   :  { %v412_v26 = vadd.bf16 %v410_v3, %v398_v41 }
 0x173   :  { %v538_v11 = vpop.permute.xlu1 %537 }
 0x174   :  { %v1927_v12 = vcombine.low %v412_v26, %v413_v10  ;;  %vm542_vm15 = vcmp.eq.s32.totalorder %v538_v11, 1 }
 0x175   :  { %vm544_vm2 = vmpackc.low %vm542_vm15, %vm542_vm15 }
 0x176   :  { %776 = vmatpush1.bf16.msra.mxu0 %v1927_v12  ;;  %v546_v21 = vsel %vm544_vm2, %v1462_v56, 0 }
 0x177   :  { %v541_v7 = vpop.permute.xlu1 %540  ;;  %v548_v6 = vadd.bf16 %v546_v21, %v534_v20  ;;  %v851_v21 = vunpack.c.l.bf16 %v1927_v12  ;;  %v859_v20 = vunpack.c.h.bf16 %v1927_v12 }
 0x178   :  { %vm543_vm4 = vcmp.eq.s32.totalorder %v541_v7, 1 }
 0x179   :  { %vm545_vm11 = vmpackc.low %vm543_vm4, %vm543_vm4  ;;  %986 = vmatmul.mubr.msk.bf16.vlgmr.msra.gmra.mxu0 %vm2103_vm8, %v1618_v4 }
 0x17a   :  { %v547_v23 = vsel %vm545_vm11, %v1508_v8, 0 }
 0x17b   :  { %v549_v34 = vadd.bf16 %v547_v23, %v535_v13 }
 0x17d   :  { %v1939_v24 = vcombine.low %v548_v6, %v549_v34  ;;  %v852_v6 = vunpack.c.l.bf16 %v1872_v1 }
 0x17f   :  { %819 = vmatpush1.bf16.msra.mxu1 %v1939_v24  ;;  %v861_v12 = vunpack.c.h.bf16 %v1939_v24 }
 0x182   :  { %987 = vmatmul.mubr.msk.bf16.vlgmr.msra.gmra.mxu1 %vm2104_vm6, %v1618_v4 }
 0x1c1   :  { %v709_v47 = vpop.f32.mrf.mxu0 }
 0x1c2   :  { %v863_v28 = vmul.f32 %v847_v49, %v709_v47  ;;  %v860_v47 = vunpack.c.h.bf16 %v1872_v1  ;;  %v854_v1 = vunpack.c.l.bf16 %v1902_v0 }
 0x1c3   :  { %v711_v56 = vpop.f32.mrf.mxu0 }
 0x1c4   :  { %v864_v25 = vmul.f32 %v848_v62, %v711_v56 }
 0x1c5   :  { %v713_v29 = vpop.f32.mrf.mxu0 }
 0x1c6   :  { %v871_v8 = vmul.f32 %v855_v22, %v713_v29 }
 0x1c7   :  { %v715_v31 = vpop.f32.mrf.mxu0 }
 0x1c8   :  { %v879_v32 = vadd.f32 %v871_v8, %v863_v28  ;;  %v872_v37 = vmul.f32 %v856_v30, %v715_v31 }
 0x1ca   :  { %v880_v35 = vrot.slane %v879_v32, 4  ;;  %v886_v36 = vadd.f32 %v872_v37, %v864_v25  ;;  %v752_v4 = vpop.f32.mrf.mxu1 }
 0x1cb   :  { %v865_v51 = vmul.f32 %v849_v19, %v752_v4 }
 0x1cc   :  { %v881_v38 = vadd.f32 %v880_v35, %v879_v32  ;;  %v887_v39 = vrot.slane %v886_v36, 4  ;;  %v754_v44 = vpop.f32.mrf.mxu1  ;;  %v853_v32 = vunpack.c.l.bf16 %v1939_v24 }
 0x1cd   :  { %v866_v17 = vmul.f32 %v850_v33, %v754_v44 }
 0x1ce   :  { %v882_v46 = vrot.slane %v881_v38, 2  ;;  %v888_v50 = vadd.f32 %v887_v39, %v886_v36  ;;  %v756_v54 = vpop.f32.mrf.mxu1  ;;  %v862_v39 = vunpack.c.h.bf16 %v1902_v0 }
 0x1cf   :  { %v873_v43 = vmul.f32 %v857_v2, %v756_v54 }
 0x1d0   :  { %v883_v45 = vadd.f32 %v882_v46, %v881_v38  ;;  %v889_v55 = vrot.slane %v888_v50, 2  ;;  %v758_v59 = vpop.f32.mrf.mxu1 }
 0x1d1   :  { %v893_v60 = vadd.f32 %v873_v43, %v865_v51  ;;  %v874_v9 = vmul.f32 %v858_v42, %v758_v59 }
 0x1d2   :  { %v884_v63 = vrot.slane %v883_v45, 1  ;;  %v890_v61 = vadd.f32 %v889_v55, %v888_v50 }
 0x1d3   :  { %v894_v52 = vrot.slane %v893_v60, 4  ;;  %v900_v41 = vadd.f32 %v874_v9, %v866_v17 }
 0x1d4   :  { %v885_v40 = vadd.f32 %v884_v63, %v883_v45  ;;  %v891_v48 = vrot.slane %v890_v61, 1 }
 0x1d5   :  { %v895_v3 = vadd.f32 %v894_v52, %v893_v60  ;;  %v901_v15 = vrot.slane %v900_v41, 4 }
 0x1d6   :  { %935 = vst [vmem:[#allocation5] sm:$0x1] %v885_v40  ;;  %v892_v5 = vadd.f32 %v891_v48, %v890_v61 }
 0x1d7   :  { %v896_v10 = vrot.slane %v895_v3, 2  ;;  %v902_v26 = vadd.f32 %v901_v15, %v900_v41  ;;  %v988_v15 = vld [vmem:[%s1970_s4] ss:$0 sm:$0xff] }
 0x1d8   :  { %936 = vst [vmem:[#allocation5 + $0x1] sm:$0x1] %v892_v5 }
 0x1d9   :  { %v897_v57 = vadd.f32 %v896_v10, %v895_v3  ;;  %v903_v27 = vrot.slane %v902_v26, 2  ;;  %v948_v3 = vpop.permute.xlu0 %947 }
 0x1db   :  { %v898_v11 = vrot.slane %v897_v57, 1  ;;  %v904_v53 = vadd.f32 %v903_v27, %v902_v26 }
 0x1dd   :  { %v899_v18 = vadd.f32 %v898_v11, %v897_v57  ;;  %v905_v14 = vrot.slane %v904_v53, 1 }
 0x1df   :  { %937 = vst [vmem:[#allocation5 + $0x2] sm:$0x1] %v899_v18  ;;  %v906_v16 = vadd.f32 %v905_v14, %v904_v53 }
 0x1e1   :  { %938 = vst [vmem:[#allocation5 + $0x3] sm:$0x1] %v906_v16 }
 0x239   :  { %v795_v58 = vpop.f32.mrf.mxu0 }
 0x23a   :  { %v867_v23 = vmul.f32 %v851_v21, %v795_v58 }
 0x23b   :  { %v797_v7 = vpop.f32.mrf.mxu0 }
 0x23c   :  { %v868_v49 = vmul.f32 %v852_v6, %v797_v7 }
 0x23d   :  { %v799_v13 = vpop.f32.mrf.mxu0 }
 0x23e   :  { %v875_v34 = vmul.f32 %v859_v20, %v799_v13 }
 0x23f   :  { %v801_v56 = vpop.f32.mrf.mxu0 }
 0x240   :  { %v907_v22 = vadd.f32 %v875_v34, %v867_v23  ;;  %v876_v29 = vmul.f32 %v860_v47, %v801_v56 }
 0x242   :  { %v908_v28 = vrot.slane %v907_v22, 4  ;;  %v914_v62 = vadd.f32 %v876_v29, %v868_v49  ;;  %v838_v8 = vpop.f32.mrf.mxu1 }
 0x243   :  { %v869_v4 = vmul.f32 %v853_v32, %v838_v8 }
 0x244   :  { %v909_v30 = vadd.f32 %v908_v28, %v907_v22  ;;  %v915_v31 = vrot.slane %v914_v62, 4  ;;  %v840_v25 = vpop.f32.mrf.mxu1 }
 0x245   :  { %v870_v46 = vmul.f32 %v854_v1, %v840_v25 }
 0x246   :  { %v910_v37 = vrot.slane %v909_v30, 2  ;;  %v916_v35 = vadd.f32 %v915_v31, %v914_v62  ;;  %v842_v36 = vpop.f32.mrf.mxu1 }
 0x247   :  { %v877_v38 = vmul.f32 %v861_v12, %v842_v36 }
 0x248   :  { %v911_v44 = vadd.f32 %v910_v37, %v909_v30  ;;  %v917_v19 = vrot.slane %v916_v35, 2  ;;  %v844_v2 = vpop.f32.mrf.mxu1 }
 0x249   :  { %v921_v50 = vadd.f32 %v877_v38, %v869_v4  ;;  %v878_v54 = vmul.f32 %v862_v39, %v844_v2 }
 0x24a   :  { %v912_v51 = vrot.slane %v911_v44, 1  ;;  %v918_v33 = vadd.f32 %v917_v19, %v916_v35 }
 0x24b   :  { %v922_v43 = vrot.slane %v921_v50, 4  ;;  %v928_v42 = vadd.f32 %v878_v54, %v870_v46 }
 0x24c   :  { %v913_v24 = vadd.f32 %v912_v51, %v911_v44  ;;  %v919_v45 = vrot.slane %v918_v33, 1 }
 0x24d   :  { %v923_v55 = vadd.f32 %v922_v43, %v921_v50  ;;  %v929_v59 = vrot.slane %v928_v42, 4 }
 0x24e   :  { %939 = vst [vmem:[#allocation5 + $0x4] sm:$0x1] %v913_v24  ;;  %v920_v17 = vadd.f32 %v919_v45, %v918_v33 }
 0x24f   :  { %v924_v60 = vrot.slane %v923_v55, 2  ;;  %v930_v9 = vadd.f32 %v929_v59, %v928_v42 }
 0x250   :  { %940 = vst [vmem:[#allocation5 + $0x5] sm:$0x1] %v920_v17 }
 0x251   :  { %v925_v0 = vadd.f32 %v924_v60, %v923_v55  ;;  %v931_v63 = vrot.slane %v930_v9, 2 }
 0x253   :  { %v926_v61 = vrot.slane %v925_v0, 1  ;;  %v932_v52 = vadd.f32 %v931_v63, %v930_v9 }
 0x255   :  { %v927_v41 = vadd.f32 %v926_v61, %v925_v0  ;;  %v933_v40 = vrot.slane %v932_v52, 1 }
 0x257   :  { %941 = vst [vmem:[#allocation5 + $0x6] sm:$0x1] %v927_v41  ;;  %v934_v48 = vadd.f32 %v933_v40, %v932_v52 }
 0x259   :  { %942 = vst [vmem:[#allocation5 + $0x7] sm:$0x1] %v934_v48 }
 0x260   :  { %v943_v5 = vld [vmem:[#allocation5] sm:$0xff] }
 0x261   :  { %v950_v10 = vmul.f32 %v948_v3, %v943_v5 }
 0x263   :  { %v958_v26 = vmul.f32 %v988_v15, %v950_v10 }
 0x265   :  { %959 = vst [vmem:[#allocation5] sm:$0xff] %v958_v26 }
 0x266   :  { %1074 = shalt.err (!%p1071_p9)
}
 0x267   :  { %969 = dma.vmem_to_hbm [thread:$0]  %s967_s7, 128, %s1971_s5, [#allocation4]  }
 0x268   :  { %1085 = dma.done.wait [#allocation4], 128  }
 0x269   :  { %1086 = vsyncadd [#allocation4], 4294967168 }
 0x26a   :  { %973 = vsyncpa [#allocation3], 1 }
 0x26b   :  { %974 = vsyncpa [#allocation4], 1 }

</bundles_post_ra>
